<compile_context>
chip_gen: v7x
topology: tpu7x:2x2x1
jax: 0.10.0
libtpu: 0.0.40
codegen_flags: <defaults>
</compile_context>

<pallas_src>
import functools
import math

import numpy as np
import jax
import jax.numpy as jnp
from jax import lax
from jax.experimental import pallas as pl
from jax.experimental.pallas import tpu as pltpu

BALANCE = 5.0 / 45.0 - 0.1   # Taiji balance coefficient from LoShuLayer.forward


# ----------------------------- trigram activations ----------------------------

def _sigmoid(z):
    return 1.0 / (1.0 + jnp.exp(-z))


def _elu(z):
    # alpha = 1.0 (PyTorch default); guard exp against overflow in the unused branch.
    return jnp.where(z > 0.0, z, jnp.exp(jnp.minimum(z, 0.0)) - 1.0)


def _softplus(z):
    # numerically stable log(1 + exp(z))
    return jnp.maximum(z, 0.0) + jnp.log(1.0 + jnp.exp(-jnp.abs(z)))


def _erf(z):
    # Abramowitz & Stegun 7.1.26 polynomial (|err| < 1.5e-7).  Avoids relying on
    # an erf primitive lowering inside Mosaic; only exp/mul/add on VPU/EUP.
    p = 0.3275911
    a1, a2, a3, a4, a5 = (0.254829592, -0.284496736, 1.421413741,
                          -1.453152027, 1.061405429)
    s = jnp.where(z >= 0.0, 1.0, -1.0)
    az = jnp.abs(z)
    t = 1.0 / (1.0 + p * az)
    poly = ((((a5 * t + a4) * t + a3) * t + a2) * t + a1) * t
    return s * (1.0 - poly * jnp.exp(-az * az))


def _gelu_exact(z):
    # PyTorch default F.gelu: exact erf formulation.
    return 0.5 * z * (1.0 + _erf(z * 0.7071067811865476))


def _apply_trigram(code, v):
    """Trigram activation for the 3-bit line code (code = l0*4 + l1*2 + l2).

    `code` is a static Python int, so each call traces exactly one activation.
    """
    if code == 0:                                    # 000 kun
        return _sigmoid(v)
    if code == 1:                                    # 001 zhen (leaky_relu, 0.2)
        return jnp.where(v >= 0.0, v, 0.2 * v)
    if code == 2:                                    # 010 kan
        return jnp.tanh(v)
    if code == 3:                                    # 011 dui
        return _elu(v) + 0.2 * v
    if code == 4:                                    # 100 gen (clamp is in the spec)
        return _gelu_exact(jnp.clip(v, -5.0, 5.0))
    if code == 5:                                    # 101 li
        return v * _sigmoid(1.2 * v)
    if code == 6:                                    # 110 xun
        return _softplus(v)
    return _elu(v) + 0.5 * jnp.tanh(v)               # 111 qian


# ----------------------------- hexagram activation -----------------------------

def _hexagram_codes(y):
    """Full-tensor statistics -> (upper_code, lower_code) as (1,1) int32 arrays.

    Reductions: sum, centered sum-of-squares, max, min, and ONE packed count
    reduce (the |y|<0.01 count and the y>0 count share a single sum; exact in
    f32 since both counts are integers < mult and mult*n < 2^24).  The centered
    two-pass variance matches torch.std (unbiased) and avoids cancellation.
    """
    n = float(y.shape[0] * y.shape[1])

    sum_y = jnp.sum(y, keepdims=True)                               # (1,1)
    mean = sum_y * (1.0 / n)
    d = y - mean
    var = jnp.sum(d * d, keepdims=True) * (1.0 / (n - 1.0))         # unbiased
    std = jnp.sqrt(var)
    max_y = jnp.max(y, keepdims=True)
    min_y = jnp.min(y, keepdims=True)

    mult = float(1 << int(math.ceil(math.log2(n + 1.0))))
    small_f = (jnp.abs(y) < 0.01).astype(jnp.float32)
    pos_f = (y > 0.0).astype(jnp.float32)
    packed = jnp.sum(small_f + mult * pos_f, keepdims=True)
    pos_ct = (packed * (1.0 / mult)).astype(jnp.int32).astype(jnp.float32)  # exact floor
    small_ct = packed - mult * pos_ct

    l0 = (mean > 0.0).astype(jnp.int32)
    l1 = (std > 0.5).astype(jnp.int32)
    l2 = ((max_y - min_y) > 1.0).astype(jnp.int32)
    l3 = (small_ct < 0.5 * n).astype(jnp.int32)        # sparsity < 0.5
    l4 = (jnp.abs(mean) < std).astype(jnp.int32)
    l5 = (pos_ct > 0.5 * n).astype(jnp.int32)

    upper_code = l0 * 4 + l1 * 2 + l2                  # lines[:3]
    lower_code = l3 * 4 + l4 * 2 + l5                  # lines[3:]
    return upper_code, lower_code


def _hexagram_apply(y, upper_code, lower_code):
    """Composite hexagram activation with vector selects (no scalar gating).

    x >= 0 -> upper_trigram(x);  x < 0 -> -lower_trigram(-x).  Both branch
    inputs are |x|, so each trigram is evaluated exactly once and reused by
    both the upper and the lower select chain (8 evaluations total).
    """
    ucb = jnp.broadcast_to(upper_code, y.shape)        # broadcasts hoisted out of the loop
    lcb = jnp.broadcast_to(lower_code, y.shape)
    a = jnp.abs(y)
    pos = _apply_trigram(0, a)
    neg = pos
    for code in range(1, 8):
        act = _apply_trigram(code, a)
        pos = jnp.where(ucb == code, act, pos)
        neg = jnp.where(lcb == code, act, neg)
    return jnp.where(y >= 0.0, pos, -neg)


# ----------------------------- fused Pallas kernel -----------------------------

def _make_fused_kernel(layer_dims, padded_dim):
    """Kernel factory.  Refs: x (B,P), w_packed (L,P,P), b_packed (L,1,P), out."""
    num_layers = len(layer_dims)

    def kernel(x_ref, w_ref, b_ref, out_ref):
        h = x_ref[...]                                  # (B, P), zero-padded features
        for layer in range(num_layers):
            out_f = layer_dims[layer][1]
            w = w_ref[layer]                            # (P, P): transposed + Taiji-folded + zero-padded
            b = b_ref[layer]                            # (1, P)
            # LoShuLayer (linear + Taiji balance) — balance pre-folded into w, b.
            y = jnp.dot(h, w, preferred_element_type=jnp.float32) + b
            if layer < num_layers - 1:
                # Stats over the TRUE activation width only.  Padded columns of y
                # are exactly zero (zero weight cols / bias); whatever the
                # activation maps them to is killed by the next layer's zero
                # weight rows, so they never contaminate the result.
                y_true = y if out_f == padded_dim else y[:, :out_f]
                uc, lc = _hexagram_codes(y_true)
                h = _hexagram_apply(y, uc, lc)
            else:
                y_out = y if out_f == padded_dim else y[:, :out_f]
                out_ref[...] = y_out.astype(out_ref.dtype)

    return kernel


@functools.partial(jax.jit, static_argnames=("layer_dims",))
def loshu_nn_forward(w_packed, b_packed, x, *, layer_dims):
    """Fused forward: ONE pallas_call (3 input DMAs) for all layers + activations."""
    layer_dims = tuple(tuple(d) for d in layer_dims)
    batch = x.shape[0]
    padded_dim = w_packed.shape[-1]
    out_features = layer_dims[-1][1]

    if x.shape[1] < padded_dim:
        # Zero-pad the input features; the matching padded weight rows are zero.
        x = jnp.pad(x, ((0, 0), (0, padded_dim - x.shape[1])))

    vmem = pl.BlockSpec(memory_space=pltpu.MemorySpace.VMEM)
    return pl.pallas_call(
        _make_fused_kernel(layer_dims, padded_dim),
        out_shape=jax.ShapeDtypeStruct((batch, out_features), jnp.float32),
        in_specs=[vmem, vmem, vmem],
        out_specs=vmem,
    )(x, w_packed, b_packed)


# ------------------------ Parameter initialization -----------------------------

def _lo_shu_enhanced():
    lo_shu = np.array([[4.0, 9.0, 2.0], [3.0, 5.0, 7.0], [8.0, 1.0, 6.0]], dtype=np.float32)
    normalized = 0.5 + 0.5 * (lo_shu - lo_shu.min()) / (lo_shu.max() - lo_shu.min())
    element_mapping = {1: 'water', 2: 'earth', 3: 'wood', 4: 'wood', 5: 'earth',
                       6: 'water', 7: 'metal', 8: 'metal', 9: 'fire'}
    strengths = {'water': 1.2, 'wood': 1.1, 'fire': 1.3, 'earth': 0.9, 'metal': 0.8}
    mask = np.ones((3, 3), dtype=np.float32)
    for i in range(3):
        for j in range(3):
            mask[i, j] = strengths[element_mapping[int(lo_shu[i, j])]]
    enhanced = normalized * mask
    enhanced = enhanced / enhanced.mean() * normalized.mean()
    return enhanced.astype(np.float32)


def _weight_template(out_f, in_f):
    enh = _lo_shu_enhanced()
    template = np.ones((out_f, in_f), dtype=np.float32)
    for i in range(0, out_f, 3):
        for j in range(0, in_f, 3):
            ie = min(i + 3, out_f)
            je = min(j + 3, in_f)
            template[i:ie, j:je] = enh[:ie - i, :je - j]
    return template


def init_loshu_layer(key, in_f, out_f):
    """PyTorch-layout params: weight (out_f, in_f), bias (out_f,)."""
    kw, kb = jax.random.split(key)
    template = jnp.asarray(_weight_template(out_f, in_f))
    scale = math.sqrt(6.0 / (out_f + in_f))
    weight = template * jax.random.normal(kw, (out_f, in_f), dtype=jnp.float32) * scale
    bound = 1.0 / math.sqrt(in_f)
    bias = jax.random.uniform(kb, (out_f,), minval=0.0, maxval=bound, dtype=jnp.float32)
    return weight, bias


def init_loshu_nn(key, input_size, hidden_sizes, output_size):
    sizes = [input_size] + list(hidden_sizes) + [output_size]
    keys = jax.random.split(key, len(sizes) - 1)
    return tuple(init_loshu_layer(keys[i], sizes[i], sizes[i + 1])
                 for i in range(len(sizes) - 1))


def pack_params(raw_params):
    """Fold the Taiji balance into the weights, pre-transpose, zero-pad, stack.

        y + c*mean_j(y) == y @ M,   M = I + (c/out_f) * J   (J = all-ones)
    so  w' = w.T @ M  and  b' = b @ M   (done once, in float64, at pack time).

    Returns (w_packed (L,P,P), b_packed (L,1,P), layer_dims).  Padding is zero,
    so padded rows/columns contribute nothing to any matmul in the kernel.
    """
    raw_params = tuple(raw_params)
    layer_dims = tuple((int(w.shape[1]), int(w.shape[0])) for w, _ in raw_params)
    padded = max(max(i, o) for i, o in layer_dims)
    padded = ((padded + 7) // 8) * 8                   # sublane-friendly
    num_layers = len(raw_params)

    w_packed = np.zeros((num_layers, padded, padded), dtype=np.float32)
    b_packed = np.zeros((num_layers, 1, padded), dtype=np.float32)
    for l, (w, b) in enumerate(raw_params):
        out_f, in_f = int(w.shape[0]), int(w.shape[1])
        m = (np.eye(out_f, dtype=np.float64)
             + (BALANCE / out_f) * np.ones((out_f, out_f), dtype=np.float64))
        wt = np.asarray(w, dtype=np.float64).T @ m                  # (in_f, out_f)
        bt = np.asarray(b, dtype=np.float64).reshape(1, out_f) @ m
        w_packed[l, :in_f, :out_f] = wt.astype(np.float32)
        b_packed[l, :, :out_f] = bt.astype(np.float32)
    return jnp.asarray(w_packed), jnp.asarray(b_packed), layer_dims


# ------------------------ Pure-JAX reference (correctness check) ---------------

def loshu_nn_reference(raw_params, x):
    """Unfused, unfolded reference: explicit linear + Taiji balance per layer."""
    raw_params = tuple(raw_params)
    h = x
    for idx, (w, b) in enumerate(raw_params):
        y = jnp.dot(h, w.T, precision=lax.Precision.HIGHEST) + b
        y = y + BALANCE * jnp.mean(y, axis=1, keepdims=True)
        if idx < len(raw_params) - 1:
            uc, lc = _hexagram_codes(y)
            h = _hexagram_apply(y, uc, lc)
        else:
            h = y
    return h


# ------------------------------------ main --------------------------------------

if __name__ == "__main__":
    input_size, hidden_sizes, output_size = 16, [32, 32], 8
    batch = 4

    key = jax.random.PRNGKey(0)
    k_params, k_x = jax.random.split(key)
    raw_params = init_loshu_nn(k_params, input_size, hidden_sizes, output_size)
    x = jax.random.normal(k_x, (batch, input_size), dtype=jnp.float32)

    w_packed, b_packed, layer_dims = pack_params(raw_params)

    out = loshu_nn_forward(w_packed, b_packed, x, layer_dims=layer_dims)
    jax.block_until_ready(out)

    assert out.shape == (batch, output_size)
    assert bool(jnp.all(jnp.isfinite(out)))

    ref = jax.jit(loshu_nn_reference)(raw_params, x)
    jax.block_until_ready(ref)
    assert bool(jnp.allclose(out, ref, rtol=5e-3, atol=5e-3)), (out, ref)

    print("KERNEL_OK")
</pallas_src>

<mosaic_0001>
module attributes {stable_mosaic.version = 11 : i64} {
  func.func @kernel(%arg0: memref<4x32xf32, #tpu.memory_space<vmem>>, %arg1: memref<3x32x32xf32, #tpu.memory_space<vmem>>, %arg2: memref<3x1x32xf32, #tpu.memory_space<vmem>>, %arg3: memref<4x8xf32, #tpu.memory_space<vmem>>) attributes {dimension_semantics = [], scalar_prefetch = 0 : i64, scratch_operands = 0 : i64, tpu.core_type = #tpu.core_type<tc>} {
    %c0 = arith.constant 0 : index
    %c0_0 = arith.constant 0 : index
    %0 = vector.load %arg0[%c0, %c0_0] : memref<4x32xf32, #tpu.memory_space<vmem>>, vector<4x32xf32>
    %c0_1 = arith.constant 0 : index
    %c0_2 = arith.constant 0 : index
    %c0_3 = arith.constant 0 : index
    %1 = vector.load %arg1[%c0_1, %c0_2, %c0_3] : memref<3x32x32xf32, #tpu.memory_space<vmem>>, vector<1x32x32xf32>
    %2 = vector.shape_cast %1 : vector<1x32x32xf32> to vector<32x32xf32>
    %c0_4 = arith.constant 0 : index
    %c0_5 = arith.constant 0 : index
    %c0_6 = arith.constant 0 : index
    %3 = vector.load %arg2[%c0_4, %c0_5, %c0_6] : memref<3x1x32xf32, #tpu.memory_space<vmem>>, vector<1x1x32xf32>
    %4 = vector.shape_cast %3 : vector<1x1x32xf32> to vector<1x32xf32>
    %cst = arith.constant dense<0.000000e+00> : vector<4x32xf32>
    %5 = tpu.matmul %0, %2, %cst {dimension_numbers = #tpu.dot_dimension_numbers<[1], [0], [0], [1], [0, 0, 1, 1], [], []>} : vector<4x32xf32>, vector<32x32xf32>, vector<4x32xf32> -> vector<4x32xf32>
    %6 = vector.broadcast %4 : vector<1x32xf32> to vector<4x32xf32>
    %7 = arith.addf %5, %6 : vector<4x32xf32>
    %8 = vector.shape_cast %7 : vector<4x32xf32> to vector<1x4x32xf32>
    %cst_7 = arith.constant dense<0.000000e+00> : vector<1xf32>
    %9 = vector.multi_reduction <add>, %8, %cst_7 [1, 2] : vector<1x4x32xf32> to vector<1xf32>
    %10 = vector.shape_cast %9 : vector<1xf32> to vector<1x1x1xf32>
    %11 = vector.extract %10[0, 0, 0] : f32 from vector<1x1x1xf32>
    %12 = vector.broadcast %11 : f32 to vector<1x1xf32>
    %cst_8 = arith.constant 7.812500e-03 : f32
    %13 = vector.broadcast %cst_8 : f32 to vector<1x1xf32>
    %14 = arith.mulf %12, %13 : vector<1x1xf32>
    %15 = vector.broadcast %14 : vector<1x1xf32> to vector<4x32xf32>
    %16 = arith.subf %7, %15 : vector<4x32xf32>
    %17 = arith.mulf %16, %16 : vector<4x32xf32>
    %18 = vector.shape_cast %17 : vector<4x32xf32> to vector<1x4x32xf32>
    %cst_9 = arith.constant dense<0.000000e+00> : vector<1xf32>
    %19 = vector.multi_reduction <add>, %18, %cst_9 [1, 2] : vector<1x4x32xf32> to vector<1xf32>
    %20 = vector.shape_cast %19 : vector<1xf32> to vector<1x1x1xf32>
    %21 = vector.extract %20[0, 0, 0] : f32 from vector<1x1x1xf32>
    %22 = vector.broadcast %21 : f32 to vector<1x1xf32>
    %cst_10 = arith.constant 0.00787401571 : f32
    %23 = vector.broadcast %cst_10 : f32 to vector<1x1xf32>
    %24 = arith.mulf %22, %23 : vector<1x1xf32>
    %25 = math.sqrt %24 : vector<1x1xf32>
    %26 = vector.shape_cast %7 : vector<4x32xf32> to vector<1x4x32xf32>
    %cst_11 = arith.constant dense<0xFF800000> : vector<1xf32>
    %27 = vector.multi_reduction <maximumf>, %26, %cst_11 [1, 2] : vector<1x4x32xf32> to vector<1xf32>
    %28 = vector.shape_cast %27 : vector<1xf32> to vector<1x1x1xf32>
    %29 = vector.extract %28[0, 0, 0] : f32 from vector<1x1x1xf32>
    %30 = vector.broadcast %29 : f32 to vector<1x1xf32>
    %31 = vector.shape_cast %7 : vector<4x32xf32> to vector<1x4x32xf32>
    %cst_12 = arith.constant dense<0x7F800000> : vector<1xf32>
    %32 = vector.multi_reduction <minimumf>, %31, %cst_12 [1, 2] : vector<1x4x32xf32> to vector<1xf32>
    %33 = vector.shape_cast %32 : vector<1xf32> to vector<1x1x1xf32>
    %34 = vector.extract %33[0, 0, 0] : f32 from vector<1x1x1xf32>
    %35 = vector.broadcast %34 : f32 to vector<1x1xf32>
    %36 = math.absf %7 : vector<4x32xf32>
    %cst_13 = arith.constant 0.00999999977 : f32
    %37 = vector.broadcast %cst_13 : f32 to vector<4x32xf32>
    %38 = arith.cmpf olt, %36, %37 : vector<4x32xf32>
    %39 = arith.extui %38 : vector<4x32xi1> to vector<4x32xi32>
    %40 = arith.sitofp %39 : vector<4x32xi32> to vector<4x32xf32>
    %cst_14 = arith.constant 0.000000e+00 : f32
    %41 = vector.broadcast %cst_14 : f32 to vector<4x32xf32>
    %42 = arith.cmpf ogt, %7, %41 : vector<4x32xf32>
    %43 = arith.extui %42 : vector<4x32xi1> to vector<4x32xi32>
    %44 = arith.sitofp %43 : vector<4x32xi32> to vector<4x32xf32>
    %cst_15 = arith.constant 2.560000e+02 : f32
    %45 = vector.broadcast %cst_15 : f32 to vector<4x32xf32>
    %46 = arith.mulf %45, %44 : vector<4x32xf32>
    %47 = arith.addf %40, %46 : vector<4x32xf32>
    %48 = vector.shape_cast %47 : vector<4x32xf32> to vector<1x4x32xf32>
    %cst_16 = arith.constant dense<0.000000e+00> : vector<1xf32>
    %49 = vector.multi_reduction <add>, %48, %cst_16 [1, 2] : vector<1x4x32xf32> to vector<1xf32>
    %50 = vector.shape_cast %49 : vector<1xf32> to vector<1x1x1xf32>
    %51 = vector.extract %50[0, 0, 0] : f32 from vector<1x1x1xf32>
    %52 = vector.broadcast %51 : f32 to vector<1x1xf32>
    %cst_17 = arith.constant 3.906250e-03 : f32
    %53 = vector.broadcast %cst_17 : f32 to vector<1x1xf32>
    %54 = arith.mulf %52, %53 : vector<1x1xf32>
    %55 = arith.fptosi %54 : vector<1x1xf32> to vector<1x1xi32>
    %56 = arith.sitofp %55 : vector<1x1xi32> to vector<1x1xf32>
    %cst_18 = arith.constant 2.560000e+02 : f32
    %57 = vector.broadcast %cst_18 : f32 to vector<1x1xf32>
    %58 = arith.mulf %57, %56 : vector<1x1xf32>
    %59 = arith.subf %52, %58 : vector<1x1xf32>
    %cst_19 = arith.constant 0.000000e+00 : f32
    %60 = vector.broadcast %cst_19 : f32 to vector<1x1xf32>
    %61 = arith.cmpf ogt, %14, %60 : vector<1x1xf32>
    %62 = arith.extui %61 : vector<1x1xi1> to vector<1x1xi32>
    %cst_20 = arith.constant 5.000000e-01 : f32
    %63 = vector.broadcast %cst_20 : f32 to vector<1x1xf32>
    %64 = arith.cmpf ogt, %25, %63 : vector<1x1xf32>
    %65 = arith.extui %64 : vector<1x1xi1> to vector<1x1xi32>
    %66 = arith.subf %30, %35 : vector<1x1xf32>
    %cst_21 = arith.constant 1.000000e+00 : f32
    %67 = vector.broadcast %cst_21 : f32 to vector<1x1xf32>
    %68 = arith.cmpf ogt, %66, %67 : vector<1x1xf32>
    %69 = arith.extui %68 : vector<1x1xi1> to vector<1x1xi32>
    %cst_22 = arith.constant 6.400000e+01 : f32
    %70 = vector.broadcast %cst_22 : f32 to vector<1x1xf32>
    %71 = arith.cmpf olt, %59, %70 : vector<1x1xf32>
    %72 = arith.extui %71 : vector<1x1xi1> to vector<1x1xi32>
    %73 = math.absf %14 : vector<1x1xf32>
    %74 = arith.cmpf olt, %73, %25 : vector<1x1xf32>
    %75 = arith.extui %74 : vector<1x1xi1> to vector<1x1xi32>
    %cst_23 = arith.constant 6.400000e+01 : f32
    %76 = vector.broadcast %cst_23 : f32 to vector<1x1xf32>
    %77 = arith.cmpf ogt, %56, %76 : vector<1x1xf32>
    %78 = arith.extui %77 : vector<1x1xi1> to vector<1x1xi32>
    %c4_i32 = arith.constant 4 : i32
    %79 = vector.broadcast %c4_i32 : i32 to vector<1x1xi32>
    %80 = arith.muli %62, %79 : vector<1x1xi32>
    %c2_i32 = arith.constant 2 : i32
    %81 = vector.broadcast %c2_i32 : i32 to vector<1x1xi32>
    %82 = arith.muli %65, %81 : vector<1x1xi32>
    %83 = arith.addi %80, %82 : vector<1x1xi32>
    %84 = arith.addi %83, %69 : vector<1x1xi32>
    %c4_i32_24 = arith.constant 4 : i32
    %85 = vector.broadcast %c4_i32_24 : i32 to vector<1x1xi32>
    %86 = arith.muli %72, %85 : vector<1x1xi32>
    %c2_i32_25 = arith.constant 2 : i32
    %87 = vector.broadcast %c2_i32_25 : i32 to vector<1x1xi32>
    %88 = arith.muli %75, %87 : vector<1x1xi32>
    %89 = arith.addi %86, %88 : vector<1x1xi32>
    %90 = arith.addi %89, %78 : vector<1x1xi32>
    %91 = vector.shape_cast %84 : vector<1x1xi32> to vector<1x1xi32>
    %92 = vector.broadcast %91 : vector<1x1xi32> to vector<4x32xi32>
    %93 = vector.shape_cast %90 : vector<1x1xi32> to vector<1x1xi32>
    %94 = vector.broadcast %93 : vector<1x1xi32> to vector<4x32xi32>
    %95 = math.absf %7 : vector<4x32xf32>
    %cst_26 = arith.constant 0.000000e+00 : f32
    %96 = vector.broadcast %cst_26 : f32 to vector<4x32xf32>
    %97 = arith.subf %96, %95 : vector<4x32xf32>
    %98 = math.exp %97 : vector<4x32xf32>
    %cst_27 = arith.constant 1.000000e+00 : f32
    %99 = vector.broadcast %cst_27 : f32 to vector<4x32xf32>
    %100 = arith.addf %99, %98 : vector<4x32xf32>
    %cst_28 = arith.constant 1.000000e+00 : f32
    %101 = vector.broadcast %cst_28 : f32 to vector<4x32xf32>
    %102 = arith.divf %101, %100 : vector<4x32xf32>
    %cst_29 = arith.constant 0.000000e+00 : f32
    %103 = vector.broadcast %cst_29 : f32 to vector<4x32xf32>
    %104 = arith.cmpf oge, %95, %103 : vector<4x32xf32>
    %cst_30 = arith.constant 2.000000e-01 : f32
    %105 = vector.broadcast %cst_30 : f32 to vector<4x32xf32>
    %106 = arith.mulf %105, %95 : vector<4x32xf32>
    %107 = arith.select %104, %95, %106 : vector<4x32xi1>, vector<4x32xf32>
    %c1_i32 = arith.constant 1 : i32
    %108 = vector.broadcast %c1_i32 : i32 to vector<4x32xi32>
    %109 = arith.cmpi eq, %92, %108 : vector<4x32xi32>
    %110 = arith.select %109, %107, %102 : vector<4x32xi1>, vector<4x32xf32>
    %c1_i32_31 = arith.constant 1 : i32
    %111 = vector.broadcast %c1_i32_31 : i32 to vector<4x32xi32>
    %112 = arith.cmpi eq, %94, %111 : vector<4x32xi32>
    %113 = arith.select %112, %107, %102 : vector<4x32xi1>, vector<4x32xf32>
    %114 = math.tanh %95 : vector<4x32xf32>
    %c2_i32_32 = arith.constant 2 : i32
    %115 = vector.broadcast %c2_i32_32 : i32 to vector<4x32xi32>
    %116 = arith.cmpi eq, %92, %115 : vector<4x32xi32>
    %117 = arith.select %116, %114, %110 : vector<4x32xi1>, vector<4x32xf32>
    %c2_i32_33 = arith.constant 2 : i32
    %118 = vector.broadcast %c2_i32_33 : i32 to vector<4x32xi32>
    %119 = arith.cmpi eq, %94, %118 : vector<4x32xi32>
    %120 = arith.select %119, %114, %113 : vector<4x32xi1>, vector<4x32xf32>
    %cst_34 = arith.constant 0.000000e+00 : f32
    %121 = vector.broadcast %cst_34 : f32 to vector<4x32xf32>
    %122 = arith.cmpf ogt, %95, %121 : vector<4x32xf32>
    %cst_35 = arith.constant 0.000000e+00 : f32
    %123 = vector.broadcast %cst_35 : f32 to vector<4x32xf32>
    %124 = arith.minimumf %95, %123 : vector<4x32xf32>
    %125 = math.exp %124 : vector<4x32xf32>
    %cst_36 = arith.constant 1.000000e+00 : f32
    %126 = vector.broadcast %cst_36 : f32 to vector<4x32xf32>
    %127 = arith.subf %125, %126 : vector<4x32xf32>
    %128 = arith.select %122, %95, %127 : vector<4x32xi1>, vector<4x32xf32>
    %cst_37 = arith.constant 2.000000e-01 : f32
    %129 = vector.broadcast %cst_37 : f32 to vector<4x32xf32>
    %130 = arith.mulf %129, %95 : vector<4x32xf32>
    %131 = arith.addf %128, %130 : vector<4x32xf32>
    %c3_i32 = arith.constant 3 : i32
    %132 = vector.broadcast %c3_i32 : i32 to vector<4x32xi32>
    %133 = arith.cmpi eq, %92, %132 : vector<4x32xi32>
    %134 = arith.select %133, %131, %117 : vector<4x32xi1>, vector<4x32xf32>
    %c3_i32_38 = arith.constant 3 : i32
    %135 = vector.broadcast %c3_i32_38 : i32 to vector<4x32xi32>
    %136 = arith.cmpi eq, %94, %135 : vector<4x32xi32>
    %137 = arith.select %136, %131, %120 : vector<4x32xi1>, vector<4x32xf32>
    %cst_39 = arith.constant -5.000000e+00 : f32
    %cst_40 = arith.constant 5.000000e+00 : f32
    %138 = vector.broadcast %cst_39 : f32 to vector<4x32xf32>
    %139 = arith.maximumf %138, %95 : vector<4x32xf32>
    %140 = vector.broadcast %cst_40 : f32 to vector<4x32xf32>
    %141 = arith.minimumf %140, %139 : vector<4x32xf32>
    %cst_41 = arith.constant 5.000000e-01 : f32
    %142 = vector.broadcast %cst_41 : f32 to vector<4x32xf32>
    %143 = arith.mulf %142, %141 : vector<4x32xf32>
    %cst_42 = arith.constant 0.707106769 : f32
    %144 = vector.broadcast %cst_42 : f32 to vector<4x32xf32>
    %145 = arith.mulf %141, %144 : vector<4x32xf32>
    %cst_43 = arith.constant 0.000000e+00 : f32
    %146 = vector.broadcast %cst_43 : f32 to vector<4x32xf32>
    %147 = arith.cmpf oge, %145, %146 : vector<4x32xf32>
    %cst_44 = arith.constant 1.000000e+00 : f32
    %cst_45 = arith.constant -1.000000e+00 : f32
    %148 = vector.broadcast %cst_44 : f32 to vector<4x32xf32>
    %149 = vector.broadcast %cst_45 : f32 to vector<4x32xf32>
    %150 = arith.select %147, %148, %149 : vector<4x32xi1>, vector<4x32xf32>
    %151 = math.absf %145 : vector<4x32xf32>
    %cst_46 = arith.constant 0.327591091 : f32
    %152 = vector.broadcast %cst_46 : f32 to vector<4x32xf32>
    %153 = arith.mulf %152, %151 : vector<4x32xf32>
    %cst_47 = arith.constant 1.000000e+00 : f32
    %154 = vector.broadcast %cst_47 : f32 to vector<4x32xf32>
    %155 = arith.addf %154, %153 : vector<4x32xf32>
    %cst_48 = arith.constant 1.000000e+00 : f32
    %156 = vector.broadcast %cst_48 : f32 to vector<4x32xf32>
    %157 = arith.divf %156, %155 : vector<4x32xf32>
    %cst_49 = arith.constant 1.06140542 : f32
    %158 = vector.broadcast %cst_49 : f32 to vector<4x32xf32>
    %159 = arith.mulf %158, %157 : vector<4x32xf32>
    %cst_50 = arith.constant -1.45315206 : f32
    %160 = vector.broadcast %cst_50 : f32 to vector<4x32xf32>
    %161 = arith.addf %159, %160 : vector<4x32xf32>
    %162 = arith.mulf %161, %157 : vector<4x32xf32>
    %cst_51 = arith.constant 1.42141378 : f32
    %163 = vector.broadcast %cst_51 : f32 to vector<4x32xf32>
    %164 = arith.addf %162, %163 : vector<4x32xf32>
    %165 = arith.mulf %164, %157 : vector<4x32xf32>
    %cst_52 = arith.constant -0.284496725 : f32
    %166 = vector.broadcast %cst_52 : f32 to vector<4x32xf32>
    %167 = arith.addf %165, %166 : vector<4x32xf32>
    %168 = arith.mulf %167, %157 : vector<4x32xf32>
    %cst_53 = arith.constant 0.254829586 : f32
    %169 = vector.broadcast %cst_53 : f32 to vector<4x32xf32>
    %170 = arith.addf %168, %169 : vector<4x32xf32>
    %171 = arith.mulf %170, %157 : vector<4x32xf32>
    %cst_54 = arith.constant 0.000000e+00 : f32
    %172 = vector.broadcast %cst_54 : f32 to vector<4x32xf32>
    %173 = arith.subf %172, %151 : vector<4x32xf32>
    %174 = arith.mulf %173, %151 : vector<4x32xf32>
    %175 = math.exp %174 : vector<4x32xf32>
    %176 = arith.mulf %171, %175 : vector<4x32xf32>
    %cst_55 = arith.constant 1.000000e+00 : f32
    %177 = vector.broadcast %cst_55 : f32 to vector<4x32xf32>
    %178 = arith.subf %177, %176 : vector<4x32xf32>
    %179 = arith.mulf %150, %178 : vector<4x32xf32>
    %cst_56 = arith.constant 1.000000e+00 : f32
    %180 = vector.broadcast %cst_56 : f32 to vector<4x32xf32>
    %181 = arith.addf %180, %179 : vector<4x32xf32>
    %182 = arith.mulf %143, %181 : vector<4x32xf32>
    %c4_i32_57 = arith.constant 4 : i32
    %183 = vector.broadcast %c4_i32_57 : i32 to vector<4x32xi32>
    %184 = arith.cmpi eq, %92, %183 : vector<4x32xi32>
    %185 = arith.select %184, %182, %134 : vector<4x32xi1>, vector<4x32xf32>
    %c4_i32_58 = arith.constant 4 : i32
    %186 = vector.broadcast %c4_i32_58 : i32 to vector<4x32xi32>
    %187 = arith.cmpi eq, %94, %186 : vector<4x32xi32>
    %188 = arith.select %187, %182, %137 : vector<4x32xi1>, vector<4x32xf32>
    %cst_59 = arith.constant 1.200000e+00 : f32
    %189 = vector.broadcast %cst_59 : f32 to vector<4x32xf32>
    %190 = arith.mulf %189, %95 : vector<4x32xf32>
    %cst_60 = arith.constant 0.000000e+00 : f32
    %191 = vector.broadcast %cst_60 : f32 to vector<4x32xf32>
    %192 = arith.subf %191, %190 : vector<4x32xf32>
    %193 = math.exp %192 : vector<4x32xf32>
    %cst_61 = arith.constant 1.000000e+00 : f32
    %194 = vector.broadcast %cst_61 : f32 to vector<4x32xf32>
    %195 = arith.addf %194, %193 : vector<4x32xf32>
    %cst_62 = arith.constant 1.000000e+00 : f32
    %196 = vector.broadcast %cst_62 : f32 to vector<4x32xf32>
    %197 = arith.divf %196, %195 : vector<4x32xf32>
    %198 = arith.mulf %95, %197 : vector<4x32xf32>
    %c5_i32 = arith.constant 5 : i32
    %199 = vector.broadcast %c5_i32 : i32 to vector<4x32xi32>
    %200 = arith.cmpi eq, %92, %199 : vector<4x32xi32>
    %201 = arith.select %200, %198, %185 : vector<4x32xi1>, vector<4x32xf32>
    %c5_i32_63 = arith.constant 5 : i32
    %202 = vector.broadcast %c5_i32_63 : i32 to vector<4x32xi32>
    %203 = arith.cmpi eq, %94, %202 : vector<4x32xi32>
    %204 = arith.select %203, %198, %188 : vector<4x32xi1>, vector<4x32xf32>
    %cst_64 = arith.constant 0.000000e+00 : f32
    %205 = vector.broadcast %cst_64 : f32 to vector<4x32xf32>
    %206 = arith.maximumf %95, %205 : vector<4x32xf32>
    %207 = math.absf %95 : vector<4x32xf32>
    %cst_65 = arith.constant 0.000000e+00 : f32
    %208 = vector.broadcast %cst_65 : f32 to vector<4x32xf32>
    %209 = arith.subf %208, %207 : vector<4x32xf32>
    %210 = math.exp %209 : vector<4x32xf32>
    %cst_66 = arith.constant 1.000000e+00 : f32
    %211 = vector.broadcast %cst_66 : f32 to vector<4x32xf32>
    %212 = arith.addf %211, %210 : vector<4x32xf32>
    %213 = math.log %212 : vector<4x32xf32>
    %214 = arith.addf %206, %213 : vector<4x32xf32>
    %c6_i32 = arith.constant 6 : i32
    %215 = vector.broadcast %c6_i32 : i32 to vector<4x32xi32>
    %216 = arith.cmpi eq, %92, %215 : vector<4x32xi32>
    %217 = arith.select %216, %214, %201 : vector<4x32xi1>, vector<4x32xf32>
    %c6_i32_67 = arith.constant 6 : i32
    %218 = vector.broadcast %c6_i32_67 : i32 to vector<4x32xi32>
    %219 = arith.cmpi eq, %94, %218 : vector<4x32xi32>
    %220 = arith.select %219, %214, %204 : vector<4x32xi1>, vector<4x32xf32>
    %cst_68 = arith.constant 0.000000e+00 : f32
    %221 = vector.broadcast %cst_68 : f32 to vector<4x32xf32>
    %222 = arith.cmpf ogt, %95, %221 : vector<4x32xf32>
    %cst_69 = arith.constant 0.000000e+00 : f32
    %223 = vector.broadcast %cst_69 : f32 to vector<4x32xf32>
    %224 = arith.minimumf %95, %223 : vector<4x32xf32>
    %225 = math.exp %224 : vector<4x32xf32>
    %cst_70 = arith.constant 1.000000e+00 : f32
    %226 = vector.broadcast %cst_70 : f32 to vector<4x32xf32>
    %227 = arith.subf %225, %226 : vector<4x32xf32>
    %228 = arith.select %222, %95, %227 : vector<4x32xi1>, vector<4x32xf32>
    %229 = math.tanh %95 : vector<4x32xf32>
    %cst_71 = arith.constant 5.000000e-01 : f32
    %230 = vector.broadcast %cst_71 : f32 to vector<4x32xf32>
    %231 = arith.mulf %230, %229 : vector<4x32xf32>
    %232 = arith.addf %228, %231 : vector<4x32xf32>
    %c7_i32 = arith.constant 7 : i32
    %233 = vector.broadcast %c7_i32 : i32 to vector<4x32xi32>
    %234 = arith.cmpi eq, %92, %233 : vector<4x32xi32>
    %235 = arith.select %234, %232, %217 : vector<4x32xi1>, vector<4x32xf32>
    %c7_i32_72 = arith.constant 7 : i32
    %236 = vector.broadcast %c7_i32_72 : i32 to vector<4x32xi32>
    %237 = arith.cmpi eq, %94, %236 : vector<4x32xi32>
    %238 = arith.select %237, %232, %220 : vector<4x32xi1>, vector<4x32xf32>
    %cst_73 = arith.constant 0.000000e+00 : f32
    %239 = vector.broadcast %cst_73 : f32 to vector<4x32xf32>
    %240 = arith.cmpf oge, %7, %239 : vector<4x32xf32>
    %cst_74 = arith.constant 0.000000e+00 : f32
    %241 = vector.broadcast %cst_74 : f32 to vector<4x32xf32>
    %242 = arith.subf %241, %238 : vector<4x32xf32>
    %243 = arith.select %240, %235, %242 : vector<4x32xi1>, vector<4x32xf32>
    %c1 = arith.constant 1 : index
    %c0_75 = arith.constant 0 : index
    %c0_76 = arith.constant 0 : index
    %244 = vector.load %arg1[%c1, %c0_75, %c0_76] : memref<3x32x32xf32, #tpu.memory_space<vmem>>, vector<1x32x32xf32>
    %245 = vector.shape_cast %244 : vector<1x32x32xf32> to vector<32x32xf32>
    %c1_77 = arith.constant 1 : index
    %c0_78 = arith.constant 0 : index
    %c0_79 = arith.constant 0 : index
    %246 = vector.load %arg2[%c1_77, %c0_78, %c0_79] : memref<3x1x32xf32, #tpu.memory_space<vmem>>, vector<1x1x32xf32>
    %247 = vector.shape_cast %246 : vector<1x1x32xf32> to vector<1x32xf32>
    %cst_80 = arith.constant dense<0.000000e+00> : vector<4x32xf32>
    %248 = tpu.matmul %243, %245, %cst_80 {dimension_numbers = #tpu.dot_dimension_numbers<[1], [0], [0], [1], [0, 0, 1, 1], [], []>} : vector<4x32xf32>, vector<32x32xf32>, vector<4x32xf32> -> vector<4x32xf32>
    %249 = vector.broadcast %247 : vector<1x32xf32> to vector<4x32xf32>
    %250 = arith.addf %248, %249 : vector<4x32xf32>
    %251 = vector.shape_cast %250 : vector<4x32xf32> to vector<1x4x32xf32>
    %cst_81 = arith.constant dense<0.000000e+00> : vector<1xf32>
    %252 = vector.multi_reduction <add>, %251, %cst_81 [1, 2] : vector<1x4x32xf32> to vector<1xf32>
    %253 = vector.shape_cast %252 : vector<1xf32> to vector<1x1x1xf32>
    %254 = vector.extract %253[0, 0, 0] : f32 from vector<1x1x1xf32>
    %255 = vector.broadcast %254 : f32 to vector<1x1xf32>
    %cst_82 = arith.constant 7.812500e-03 : f32
    %256 = vector.broadcast %cst_82 : f32 to vector<1x1xf32>
    %257 = arith.mulf %255, %256 : vector<1x1xf32>
    %258 = vector.broadcast %257 : vector<1x1xf32> to vector<4x32xf32>
    %259 = arith.subf %250, %258 : vector<4x32xf32>
    %260 = arith.mulf %259, %259 : vector<4x32xf32>
    %261 = vector.shape_cast %260 : vector<4x32xf32> to vector<1x4x32xf32>
    %cst_83 = arith.constant dense<0.000000e+00> : vector<1xf32>
    %262 = vector.multi_reduction <add>, %261, %cst_83 [1, 2] : vector<1x4x32xf32> to vector<1xf32>
    %263 = vector.shape_cast %262 : vector<1xf32> to vector<1x1x1xf32>
    %264 = vector.extract %263[0, 0, 0] : f32 from vector<1x1x1xf32>
    %265 = vector.broadcast %264 : f32 to vector<1x1xf32>
    %cst_84 = arith.constant 0.00787401571 : f32
    %266 = vector.broadcast %cst_84 : f32 to vector<1x1xf32>
    %267 = arith.mulf %265, %266 : vector<1x1xf32>
    %268 = math.sqrt %267 : vector<1x1xf32>
    %269 = vector.shape_cast %250 : vector<4x32xf32> to vector<1x4x32xf32>
    %cst_85 = arith.constant dense<0xFF800000> : vector<1xf32>
    %270 = vector.multi_reduction <maximumf>, %269, %cst_85 [1, 2] : vector<1x4x32xf32> to vector<1xf32>
    %271 = vector.shape_cast %270 : vector<1xf32> to vector<1x1x1xf32>
    %272 = vector.extract %271[0, 0, 0] : f32 from vector<1x1x1xf32>
    %273 = vector.broadcast %272 : f32 to vector<1x1xf32>
    %274 = vector.shape_cast %250 : vector<4x32xf32> to vector<1x4x32xf32>
    %cst_86 = arith.constant dense<0x7F800000> : vector<1xf32>
    %275 = vector.multi_reduction <minimumf>, %274, %cst_86 [1, 2] : vector<1x4x32xf32> to vector<1xf32>
    %276 = vector.shape_cast %275 : vector<1xf32> to vector<1x1x1xf32>
    %277 = vector.extract %276[0, 0, 0] : f32 from vector<1x1x1xf32>
    %278 = vector.broadcast %277 : f32 to vector<1x1xf32>
    %279 = math.absf %250 : vector<4x32xf32>
    %cst_87 = arith.constant 0.00999999977 : f32
    %280 = vector.broadcast %cst_87 : f32 to vector<4x32xf32>
    %281 = arith.cmpf olt, %279, %280 : vector<4x32xf32>
    %282 = arith.extui %281 : vector<4x32xi1> to vector<4x32xi32>
    %283 = arith.sitofp %282 : vector<4x32xi32> to vector<4x32xf32>
    %cst_88 = arith.constant 0.000000e+00 : f32
    %284 = vector.broadcast %cst_88 : f32 to vector<4x32xf32>
    %285 = arith.cmpf ogt, %250, %284 : vector<4x32xf32>
    %286 = arith.extui %285 : vector<4x32xi1> to vector<4x32xi32>
    %287 = arith.sitofp %286 : vector<4x32xi32> to vector<4x32xf32>
    %cst_89 = arith.constant 2.560000e+02 : f32
    %288 = vector.broadcast %cst_89 : f32 to vector<4x32xf32>
    %289 = arith.mulf %288, %287 : vector<4x32xf32>
    %290 = arith.addf %283, %289 : vector<4x32xf32>
    %291 = vector.shape_cast %290 : vector<4x32xf32> to vector<1x4x32xf32>
    %cst_90 = arith.constant dense<0.000000e+00> : vector<1xf32>
    %292 = vector.multi_reduction <add>, %291, %cst_90 [1, 2] : vector<1x4x32xf32> to vector<1xf32>
    %293 = vector.shape_cast %292 : vector<1xf32> to vector<1x1x1xf32>
    %294 = vector.extract %293[0, 0, 0] : f32 from vector<1x1x1xf32>
    %295 = vector.broadcast %294 : f32 to vector<1x1xf32>
    %cst_91 = arith.constant 3.906250e-03 : f32
    %296 = vector.broadcast %cst_91 : f32 to vector<1x1xf32>
    %297 = arith.mulf %295, %296 : vector<1x1xf32>
    %298 = arith.fptosi %297 : vector<1x1xf32> to vector<1x1xi32>
    %299 = arith.sitofp %298 : vector<1x1xi32> to vector<1x1xf32>
    %cst_92 = arith.constant 2.560000e+02 : f32
    %300 = vector.broadcast %cst_92 : f32 to vector<1x1xf32>
    %301 = arith.mulf %300, %299 : vector<1x1xf32>
    %302 = arith.subf %295, %301 : vector<1x1xf32>
    %cst_93 = arith.constant 0.000000e+00 : f32
    %303 = vector.broadcast %cst_93 : f32 to vector<1x1xf32>
    %304 = arith.cmpf ogt, %257, %303 : vector<1x1xf32>
    %305 = arith.extui %304 : vector<1x1xi1> to vector<1x1xi32>
    %cst_94 = arith.constant 5.000000e-01 : f32
    %306 = vector.broadcast %cst_94 : f32 to vector<1x1xf32>
    %307 = arith.cmpf ogt, %268, %306 : vector<1x1xf32>
    %308 = arith.extui %307 : vector<1x1xi1> to vector<1x1xi32>
    %309 = arith.subf %273, %278 : vector<1x1xf32>
    %cst_95 = arith.constant 1.000000e+00 : f32
    %310 = vector.broadcast %cst_95 : f32 to vector<1x1xf32>
    %311 = arith.cmpf ogt, %309, %310 : vector<1x1xf32>
    %312 = arith.extui %311 : vector<1x1xi1> to vector<1x1xi32>
    %cst_96 = arith.constant 6.400000e+01 : f32
    %313 = vector.broadcast %cst_96 : f32 to vector<1x1xf32>
    %314 = arith.cmpf olt, %302, %313 : vector<1x1xf32>
    %315 = arith.extui %314 : vector<1x1xi1> to vector<1x1xi32>
    %316 = math.absf %257 : vector<1x1xf32>
    %317 = arith.cmpf olt, %316, %268 : vector<1x1xf32>
    %318 = arith.extui %317 : vector<1x1xi1> to vector<1x1xi32>
    %cst_97 = arith.constant 6.400000e+01 : f32
    %319 = vector.broadcast %cst_97 : f32 to vector<1x1xf32>
    %320 = arith.cmpf ogt, %299, %319 : vector<1x1xf32>
    %321 = arith.extui %320 : vector<1x1xi1> to vector<1x1xi32>
    %c4_i32_98 = arith.constant 4 : i32
    %322 = vector.broadcast %c4_i32_98 : i32 to vector<1x1xi32>
    %323 = arith.muli %305, %322 : vector<1x1xi32>
    %c2_i32_99 = arith.constant 2 : i32
    %324 = vector.broadcast %c2_i32_99 : i32 to vector<1x1xi32>
    %325 = arith.muli %308, %324 : vector<1x1xi32>
    %326 = arith.addi %323, %325 : vector<1x1xi32>
    %327 = arith.addi %326, %312 : vector<1x1xi32>
    %c4_i32_100 = arith.constant 4 : i32
    %328 = vector.broadcast %c4_i32_100 : i32 to vector<1x1xi32>
    %329 = arith.muli %315, %328 : vector<1x1xi32>
    %c2_i32_101 = arith.constant 2 : i32
    %330 = vector.broadcast %c2_i32_101 : i32 to vector<1x1xi32>
    %331 = arith.muli %318, %330 : vector<1x1xi32>
    %332 = arith.addi %329, %331 : vector<1x1xi32>
    %333 = arith.addi %332, %321 : vector<1x1xi32>
    %334 = vector.shape_cast %327 : vector<1x1xi32> to vector<1x1xi32>
    %335 = vector.broadcast %334 : vector<1x1xi32> to vector<4x32xi32>
    %336 = vector.shape_cast %333 : vector<1x1xi32> to vector<1x1xi32>
    %337 = vector.broadcast %336 : vector<1x1xi32> to vector<4x32xi32>
    %338 = math.absf %250 : vector<4x32xf32>
    %cst_102 = arith.constant 0.000000e+00 : f32
    %339 = vector.broadcast %cst_102 : f32 to vector<4x32xf32>
    %340 = arith.subf %339, %338 : vector<4x32xf32>
    %341 = math.exp %340 : vector<4x32xf32>
    %cst_103 = arith.constant 1.000000e+00 : f32
    %342 = vector.broadcast %cst_103 : f32 to vector<4x32xf32>
    %343 = arith.addf %342, %341 : vector<4x32xf32>
    %cst_104 = arith.constant 1.000000e+00 : f32
    %344 = vector.broadcast %cst_104 : f32 to vector<4x32xf32>
    %345 = arith.divf %344, %343 : vector<4x32xf32>
    %cst_105 = arith.constant 0.000000e+00 : f32
    %346 = vector.broadcast %cst_105 : f32 to vector<4x32xf32>
    %347 = arith.cmpf oge, %338, %346 : vector<4x32xf32>
    %cst_106 = arith.constant 2.000000e-01 : f32
    %348 = vector.broadcast %cst_106 : f32 to vector<4x32xf32>
    %349 = arith.mulf %348, %338 : vector<4x32xf32>
    %350 = arith.select %347, %338, %349 : vector<4x32xi1>, vector<4x32xf32>
    %c1_i32_107 = arith.constant 1 : i32
    %351 = vector.broadcast %c1_i32_107 : i32 to vector<4x32xi32>
    %352 = arith.cmpi eq, %335, %351 : vector<4x32xi32>
    %353 = arith.select %352, %350, %345 : vector<4x32xi1>, vector<4x32xf32>
    %c1_i32_108 = arith.constant 1 : i32
    %354 = vector.broadcast %c1_i32_108 : i32 to vector<4x32xi32>
    %355 = arith.cmpi eq, %337, %354 : vector<4x32xi32>
    %356 = arith.select %355, %350, %345 : vector<4x32xi1>, vector<4x32xf32>
    %357 = math.tanh %338 : vector<4x32xf32>
    %c2_i32_109 = arith.constant 2 : i32
    %358 = vector.broadcast %c2_i32_109 : i32 to vector<4x32xi32>
    %359 = arith.cmpi eq, %335, %358 : vector<4x32xi32>
    %360 = arith.select %359, %357, %353 : vector<4x32xi1>, vector<4x32xf32>
    %c2_i32_110 = arith.constant 2 : i32
    %361 = vector.broadcast %c2_i32_110 : i32 to vector<4x32xi32>
    %362 = arith.cmpi eq, %337, %361 : vector<4x32xi32>
    %363 = arith.select %362, %357, %356 : vector<4x32xi1>, vector<4x32xf32>
    %cst_111 = arith.constant 0.000000e+00 : f32
    %364 = vector.broadcast %cst_111 : f32 to vector<4x32xf32>
    %365 = arith.cmpf ogt, %338, %364 : vector<4x32xf32>
    %cst_112 = arith.constant 0.000000e+00 : f32
    %366 = vector.broadcast %cst_112 : f32 to vector<4x32xf32>
    %367 = arith.minimumf %338, %366 : vector<4x32xf32>
    %368 = math.exp %367 : vector<4x32xf32>
    %cst_113 = arith.constant 1.000000e+00 : f32
    %369 = vector.broadcast %cst_113 : f32 to vector<4x32xf32>
    %370 = arith.subf %368, %369 : vector<4x32xf32>
    %371 = arith.select %365, %338, %370 : vector<4x32xi1>, vector<4x32xf32>
    %cst_114 = arith.constant 2.000000e-01 : f32
    %372 = vector.broadcast %cst_114 : f32 to vector<4x32xf32>
    %373 = arith.mulf %372, %338 : vector<4x32xf32>
    %374 = arith.addf %371, %373 : vector<4x32xf32>
    %c3_i32_115 = arith.constant 3 : i32
    %375 = vector.broadcast %c3_i32_115 : i32 to vector<4x32xi32>
    %376 = arith.cmpi eq, %335, %375 : vector<4x32xi32>
    %377 = arith.select %376, %374, %360 : vector<4x32xi1>, vector<4x32xf32>
    %c3_i32_116 = arith.constant 3 : i32
    %378 = vector.broadcast %c3_i32_116 : i32 to vector<4x32xi32>
    %379 = arith.cmpi eq, %337, %378 : vector<4x32xi32>
    %380 = arith.select %379, %374, %363 : vector<4x32xi1>, vector<4x32xf32>
    %cst_117 = arith.constant -5.000000e+00 : f32
    %cst_118 = arith.constant 5.000000e+00 : f32
    %381 = vector.broadcast %cst_117 : f32 to vector<4x32xf32>
    %382 = arith.maximumf %381, %338 : vector<4x32xf32>
    %383 = vector.broadcast %cst_118 : f32 to vector<4x32xf32>
    %384 = arith.minimumf %383, %382 : vector<4x32xf32>
    %cst_119 = arith.constant 5.000000e-01 : f32
    %385 = vector.broadcast %cst_119 : f32 to vector<4x32xf32>
    %386 = arith.mulf %385, %384 : vector<4x32xf32>
    %cst_120 = arith.constant 0.707106769 : f32
    %387 = vector.broadcast %cst_120 : f32 to vector<4x32xf32>
    %388 = arith.mulf %384, %387 : vector<4x32xf32>
    %cst_121 = arith.constant 0.000000e+00 : f32
    %389 = vector.broadcast %cst_121 : f32 to vector<4x32xf32>
    %390 = arith.cmpf oge, %388, %389 : vector<4x32xf32>
    %cst_122 = arith.constant 1.000000e+00 : f32
    %cst_123 = arith.constant -1.000000e+00 : f32
    %391 = vector.broadcast %cst_122 : f32 to vector<4x32xf32>
    %392 = vector.broadcast %cst_123 : f32 to vector<4x32xf32>
    %393 = arith.select %390, %391, %392 : vector<4x32xi1>, vector<4x32xf32>
    %394 = math.absf %388 : vector<4x32xf32>
    %cst_124 = arith.constant 0.327591091 : f32
    %395 = vector.broadcast %cst_124 : f32 to vector<4x32xf32>
    %396 = arith.mulf %395, %394 : vector<4x32xf32>
    %cst_125 = arith.constant 1.000000e+00 : f32
    %397 = vector.broadcast %cst_125 : f32 to vector<4x32xf32>
    %398 = arith.addf %397, %396 : vector<4x32xf32>
    %cst_126 = arith.constant 1.000000e+00 : f32
    %399 = vector.broadcast %cst_126 : f32 to vector<4x32xf32>
    %400 = arith.divf %399, %398 : vector<4x32xf32>
    %cst_127 = arith.constant 1.06140542 : f32
    %401 = vector.broadcast %cst_127 : f32 to vector<4x32xf32>
    %402 = arith.mulf %401, %400 : vector<4x32xf32>
    %cst_128 = arith.constant -1.45315206 : f32
    %403 = vector.broadcast %cst_128 : f32 to vector<4x32xf32>
    %404 = arith.addf %402, %403 : vector<4x32xf32>
    %405 = arith.mulf %404, %400 : vector<4x32xf32>
    %cst_129 = arith.constant 1.42141378 : f32
    %406 = vector.broadcast %cst_129 : f32 to vector<4x32xf32>
    %407 = arith.addf %405, %406 : vector<4x32xf32>
    %408 = arith.mulf %407, %400 : vector<4x32xf32>
    %cst_130 = arith.constant -0.284496725 : f32
    %409 = vector.broadcast %cst_130 : f32 to vector<4x32xf32>
    %410 = arith.addf %408, %409 : vector<4x32xf32>
    %411 = arith.mulf %410, %400 : vector<4x32xf32>
    %cst_131 = arith.constant 0.254829586 : f32
    %412 = vector.broadcast %cst_131 : f32 to vector<4x32xf32>
    %413 = arith.addf %411, %412 : vector<4x32xf32>
    %414 = arith.mulf %413, %400 : vector<4x32xf32>
    %cst_132 = arith.constant 0.000000e+00 : f32
    %415 = vector.broadcast %cst_132 : f32 to vector<4x32xf32>
    %416 = arith.subf %415, %394 : vector<4x32xf32>
    %417 = arith.mulf %416, %394 : vector<4x32xf32>
    %418 = math.exp %417 : vector<4x32xf32>
    %419 = arith.mulf %414, %418 : vector<4x32xf32>
    %cst_133 = arith.constant 1.000000e+00 : f32
    %420 = vector.broadcast %cst_133 : f32 to vector<4x32xf32>
    %421 = arith.subf %420, %419 : vector<4x32xf32>
    %422 = arith.mulf %393, %421 : vector<4x32xf32>
    %cst_134 = arith.constant 1.000000e+00 : f32
    %423 = vector.broadcast %cst_134 : f32 to vector<4x32xf32>
    %424 = arith.addf %423, %422 : vector<4x32xf32>
    %425 = arith.mulf %386, %424 : vector<4x32xf32>
    %c4_i32_135 = arith.constant 4 : i32
    %426 = vector.broadcast %c4_i32_135 : i32 to vector<4x32xi32>
    %427 = arith.cmpi eq, %335, %426 : vector<4x32xi32>
    %428 = arith.select %427, %425, %377 : vector<4x32xi1>, vector<4x32xf32>
    %c4_i32_136 = arith.constant 4 : i32
    %429 = vector.broadcast %c4_i32_136 : i32 to vector<4x32xi32>
    %430 = arith.cmpi eq, %337, %429 : vector<4x32xi32>
    %431 = arith.select %430, %425, %380 : vector<4x32xi1>, vector<4x32xf32>
    %cst_137 = arith.constant 1.200000e+00 : f32
    %432 = vector.broadcast %cst_137 : f32 to vector<4x32xf32>
    %433 = arith.mulf %432, %338 : vector<4x32xf32>
    %cst_138 = arith.constant 0.000000e+00 : f32
    %434 = vector.broadcast %cst_138 : f32 to vector<4x32xf32>
    %435 = arith.subf %434, %433 : vector<4x32xf32>
    %436 = math.exp %435 : vector<4x32xf32>
    %cst_139 = arith.constant 1.000000e+00 : f32
    %437 = vector.broadcast %cst_139 : f32 to vector<4x32xf32>
    %438 = arith.addf %437, %436 : vector<4x32xf32>
    %cst_140 = arith.constant 1.000000e+00 : f32
    %439 = vector.broadcast %cst_140 : f32 to vector<4x32xf32>
    %440 = arith.divf %439, %438 : vector<4x32xf32>
    %441 = arith.mulf %338, %440 : vector<4x32xf32>
    %c5_i32_141 = arith.constant 5 : i32
    %442 = vector.broadcast %c5_i32_141 : i32 to vector<4x32xi32>
    %443 = arith.cmpi eq, %335, %442 : vector<4x32xi32>
    %444 = arith.select %443, %441, %428 : vector<4x32xi1>, vector<4x32xf32>
    %c5_i32_142 = arith.constant 5 : i32
    %445 = vector.broadcast %c5_i32_142 : i32 to vector<4x32xi32>
    %446 = arith.cmpi eq, %337, %445 : vector<4x32xi32>
    %447 = arith.select %446, %441, %431 : vector<4x32xi1>, vector<4x32xf32>
    %cst_143 = arith.constant 0.000000e+00 : f32
    %448 = vector.broadcast %cst_143 : f32 to vector<4x32xf32>
    %449 = arith.maximumf %338, %448 : vector<4x32xf32>
    %450 = math.absf %338 : vector<4x32xf32>
    %cst_144 = arith.constant 0.000000e+00 : f32
    %451 = vector.broadcast %cst_144 : f32 to vector<4x32xf32>
    %452 = arith.subf %451, %450 : vector<4x32xf32>
    %453 = math.exp %452 : vector<4x32xf32>
    %cst_145 = arith.constant 1.000000e+00 : f32
    %454 = vector.broadcast %cst_145 : f32 to vector<4x32xf32>
    %455 = arith.addf %454, %453 : vector<4x32xf32>
    %456 = math.log %455 : vector<4x32xf32>
    %457 = arith.addf %449, %456 : vector<4x32xf32>
    %c6_i32_146 = arith.constant 6 : i32
    %458 = vector.broadcast %c6_i32_146 : i32 to vector<4x32xi32>
    %459 = arith.cmpi eq, %335, %458 : vector<4x32xi32>
    %460 = arith.select %459, %457, %444 : vector<4x32xi1>, vector<4x32xf32>
    %c6_i32_147 = arith.constant 6 : i32
    %461 = vector.broadcast %c6_i32_147 : i32 to vector<4x32xi32>
    %462 = arith.cmpi eq, %337, %461 : vector<4x32xi32>
    %463 = arith.select %462, %457, %447 : vector<4x32xi1>, vector<4x32xf32>
    %cst_148 = arith.constant 0.000000e+00 : f32
    %464 = vector.broadcast %cst_148 : f32 to vector<4x32xf32>
    %465 = arith.cmpf ogt, %338, %464 : vector<4x32xf32>
    %cst_149 = arith.constant 0.000000e+00 : f32
    %466 = vector.broadcast %cst_149 : f32 to vector<4x32xf32>
    %467 = arith.minimumf %338, %466 : vector<4x32xf32>
    %468 = math.exp %467 : vector<4x32xf32>
    %cst_150 = arith.constant 1.000000e+00 : f32
    %469 = vector.broadcast %cst_150 : f32 to vector<4x32xf32>
    %470 = arith.subf %468, %469 : vector<4x32xf32>
    %471 = arith.select %465, %338, %470 : vector<4x32xi1>, vector<4x32xf32>
    %472 = math.tanh %338 : vector<4x32xf32>
    %cst_151 = arith.constant 5.000000e-01 : f32
    %473 = vector.broadcast %cst_151 : f32 to vector<4x32xf32>
    %474 = arith.mulf %473, %472 : vector<4x32xf32>
    %475 = arith.addf %471, %474 : vector<4x32xf32>
    %c7_i32_152 = arith.constant 7 : i32
    %476 = vector.broadcast %c7_i32_152 : i32 to vector<4x32xi32>
    %477 = arith.cmpi eq, %335, %476 : vector<4x32xi32>
    %478 = arith.select %477, %475, %460 : vector<4x32xi1>, vector<4x32xf32>
    %c7_i32_153 = arith.constant 7 : i32
    %479 = vector.broadcast %c7_i32_153 : i32 to vector<4x32xi32>
    %480 = arith.cmpi eq, %337, %479 : vector<4x32xi32>
    %481 = arith.select %480, %475, %463 : vector<4x32xi1>, vector<4x32xf32>
    %cst_154 = arith.constant 0.000000e+00 : f32
    %482 = vector.broadcast %cst_154 : f32 to vector<4x32xf32>
    %483 = arith.cmpf oge, %250, %482 : vector<4x32xf32>
    %cst_155 = arith.constant 0.000000e+00 : f32
    %484 = vector.broadcast %cst_155 : f32 to vector<4x32xf32>
    %485 = arith.subf %484, %481 : vector<4x32xf32>
    %486 = arith.select %483, %478, %485 : vector<4x32xi1>, vector<4x32xf32>
    %c2 = arith.constant 2 : index
    %c0_156 = arith.constant 0 : index
    %c0_157 = arith.constant 0 : index
    %487 = vector.load %arg1[%c2, %c0_156, %c0_157] : memref<3x32x32xf32, #tpu.memory_space<vmem>>, vector<1x32x32xf32>
    %488 = vector.shape_cast %487 : vector<1x32x32xf32> to vector<32x32xf32>
    %c2_158 = arith.constant 2 : index
    %c0_159 = arith.constant 0 : index
    %c0_160 = arith.constant 0 : index
    %489 = vector.load %arg2[%c2_158, %c0_159, %c0_160] : memref<3x1x32xf32, #tpu.memory_space<vmem>>, vector<1x1x32xf32>
    %490 = vector.shape_cast %489 : vector<1x1x32xf32> to vector<1x32xf32>
    %cst_161 = arith.constant dense<0.000000e+00> : vector<4x32xf32>
    %491 = tpu.matmul %486, %488, %cst_161 {dimension_numbers = #tpu.dot_dimension_numbers<[1], [0], [0], [1], [0, 0, 1, 1], [], []>} : vector<4x32xf32>, vector<32x32xf32>, vector<4x32xf32> -> vector<4x32xf32>
    %492 = vector.broadcast %490 : vector<1x32xf32> to vector<4x32xf32>
    %493 = arith.addf %491, %492 : vector<4x32xf32>
    %494 = vector.extract_strided_slice %493 {offsets = [0, 0], sizes = [4, 8], strides = [1, 1]} : vector<4x32xf32> to vector<4x8xf32>
    %c0_162 = arith.constant 0 : index
    %c0_163 = arith.constant 0 : index
    %495 = vector.load %arg3[%c0_162, %c0_163] : memref<4x8xf32, #tpu.memory_space<vmem>>, vector<4x8xf32>
    tpu.vector_store %arg3[%c0_162, %c0_163], %494 {strides = array<i32>} : memref<4x8xf32, #tpu.memory_space<vmem>>, vector<4x8xf32>,
    return
  }
}

</mosaic_0001>

<bundles_post_ra>
// kernel: loshu_nn_forward.1
= control target key start
LH: loop header
LB: loop body
LE: loop exit
PB: predicated region body
PF: predicated region fallthrough
CT: control target
= control target key end

     0   :  { %8 = vsyncpa [#allocation3], 0  ;;  %s1105_s0 = inlined_call_operand.vmem [shape: f32[4,32], index: 0, kind: input, shape index: {}]   ;;  %s1106_s1 = inlined_call_operand.hbm [shape: f32[3,32,32], index: 1, kind: input, shape index: {}]   ;;  %s1107_s2 = inlined_call_operand.vmem [shape: f32[3,1,32], index: 2, kind: input, shape index: {}]   ;;  %s1108_s3 = inlined_call_operand.hbm [shape: f32[4,8], index: 3, kind: output, shape index: {}]  }
   0x1   :  { %9 = vsyncpa [#allocation4], 0  ;;  %s904_s12 = smov [#allocation2]   ;;  %s856_s16 = scalar_lea.hbm %s1106_s1, 1536 }
   0x2   :  { %s17_s13 = sshll.u32 %s904_s12, 4  ;;  %p857_p0 = scmp.ne.s32.totalorder %s1106_s1, %s856_s16  ;;  %s18_s13 = int_to_ptr.vmem [resolvable:$true] %s17_s13 }
   0x3   :  { %p860_p1 = scmp.lt.u32.totalorder %s856_s16, %s1106_s1 }
   0x5   :  { %p862_p2 = pnand %p860_p1, %p857_p0 }
   0x7   :  { %865 = shalt.err (!%p862_p2)
}
   0x8   :  { %s866_s21 = scalar_lea.vmem %s18_s13, 1536  ;;  %p871_p4 = scmp.lt.s32.totalorder %s18_s13, %s18_s13 }
   0x9   :  { %p867_p3 = scmp.ne.s32.totalorder %s18_s13, %s866_s21  ;;  %p872_p5 = scmp.lt.s32.totalorder %s866_s21, %s866_s21 }
   0xb   :  { %p873_p6 = por %p872_p5, %p871_p4 }
   0xd   :  { %p874_p7 = pnand %p873_p6, %p867_p3 }
   0xf   :  { %877 = shalt.err (!%p874_p7)
}
  0x10   :  { %s905_s22 = smov 128   ;;  %s906_s23 = smov 8  }
  0x11   :  { %23 = dma.hbm_to_vmem [thread:$0]  %s1106_s1, 1536, %s18_s13, [#allocation3], %s905_s22, %s905_s22, %s906_s23  }
  0x12   :  { %900 = dma.done.wait [#allocation3], 1536  }
  0x13   :  { %901 = vsyncadd [#allocation3], 4294965760  ;;  %v907_v0 = vmov 0.0|0.0   ;;  %vm908_vm0 = vmmov 0   ;;  %v909_v1 = vmov 0.0   ;;  %v30_v2 = vld [vmem:[#allocation2] sm:$0xff] }
  0x14   :  { %765 = vmatprep.subr.bf16.mxu0 %v907_v0  ;;  %740 = vmatprep.mubr.msk.f32.mxu0 %vm908_vm0, %v909_v1  ;;  %v31_v3 = vld [vmem:[#allocation2 + $0x8] sm:$0xff]  ;;  %v32_v4 = vld [vmem:[#allocation2 + $0x10] sm:$0xff]  ;;  %v33_v6 = vld [vmem:[#allocation2 + $0x18] sm:$0xff]  ;;  %vm41_vm1 = vcmask 261120   ;;  %vm115_vm2 = vcmask 257024   ;;  %s912_s15 = smov [#allocation5]  }
  0x15   :  { %771 = vmatprep.subr.bf16.mxu1 %v907_v0  ;;  %751 = vmatprep.mubr.msk.f32.mxu1 %vm908_vm0, %v909_v1  ;;  %v766_v5 = vpack.c.bf16 %v31_v3, %v30_v2  ;;  %v769_v7 = vpack.c.bf16 %v33_v6, %v32_v4  ;;  %v29_v8 = vld [vmem:[%s1105_s0] sm:$0xf]  ;;  %v316_v35 = vld [vmem:[#allocation2 + $0x28] sm:$0xff]  ;;  %v317_v36 = vld [vmem:[#allocation2 + $0x30] sm:$0xff]  ;;  %s692_s16 = sshll.u32 %s912_s15, 4  ;;  %s693_s16 = int_to_ptr.vmem [resolvable:$true] %s692_s16 }
  0x16   :  { %v701_v9 = vld [vmem:[%s1107_s2] ss:$0 sm:$0xff]  ;;  %v318_v38 = vld [vmem:[#allocation2 + $0x38] sm:$0xff]  ;;  %s878_s17 = scalar_lea.vmem %s693_s16, 64  ;;  %p883_p9 = scmp.lt.s32.totalorder %s693_s16, %s693_s16 }
  0x17   :  { %767 = vmatpush3.bf16.msra.mxu0 %v766_v5  ;;  %v315_v34 = vld [vmem:[#allocation2 + $0x20] sm:$0xff]  ;;  %v775_v39 = vpack.c.bf16 %v318_v38, %v317_v36  ;;  %p879_p8 = scmp.ne.s32.totalorder %s693_s16, %s878_s17  ;;  %p884_p10 = scmp.lt.s32.totalorder %s878_s17, %s878_s17 }
  0x18   :  { %768 = vmatprep.subr.bf16.mxu0 %v907_v0  ;;  %v772_v37 = vpack.c.bf16 %v316_v35, %v315_v34 }
  0x19   :  { %p885_p11 = por %p884_p10, %p883_p9 }
  0x1a   :  { %773 = vmatpush3.bf16.msra.mxu1 %v772_v37 }
  0x1b   :  { %770 = vmatpush3.bf16.msra.mxu0 %v769_v7  ;;  %774 = vmatprep.subr.bf16.mxu1 %v907_v0  ;;  %p886_p12 = pnand %p885_p11, %p879_p8 }
  0x1c   :  { %777 = vmatprep.subr.bf16.mxu0 %v907_v0 }
  0x1e   :  { %741 = vmatmul.mubr.msk.f32.vlgmr.msra.gmra.mrb[0].mxu0 %vm41_vm1, %v29_v8  ;;  %776 = vmatpush3.bf16.msra.mxu1 %v775_v39 }
  0x1f   :  { %762 = vmatprep.mubr.msk.f32.mxu0 %vm908_vm0, %v909_v1 }
  0xf1   :  { %v111_v10 = vpop.f32.mrb[0].mxu0 }
  0xf2   :  { %v962_v11 = vadd.f32 %v701_v9, %v111_v10  ;;  %v742_v12 = vpop.f32.mrb[1].mxu0 }
  0xf4   :  { %v149_v13 = vsel %vm115_vm2, %v962_v11, -inf  ;;  %v116_v14 = vsel %vm115_vm2, %v962_v11, 0.0  ;;  %v160_v15 = vsel %vm115_vm2, %v962_v11, inf  ;;  %v971_v23 = vand.u32 2147483647, %v962_v11 }
  0xf5   :  { %150 = vmax.xlane.f32.xlu1 %v149_v13  ;;  %117 = vadd.xlane.f32.xlu0 %v116_v14  ;;  %vm175_vm3 = vcmp.gt.f32.partialorder %v962_v11, 0.0 }
  0xf6   :  { %v704_v25 = vsel %vm175_vm3, 1.0, %v909_v1  ;;  %vm172_vm4 = vcmp.lt.f32.partialorder %v971_v23, 0.01  ;;  %v706_v53 = vclamps-f32 %v971_v23, 5.0  ;;  %vm224_vm14 = vcmp.ge.f32.partialorder %v971_v23, 0.0 }
  0xf7   :  { %v178_v28 = vmul.f32 256.0, %v704_v25  ;;  %v703_v29 = vsel %vm172_vm4, 1.0, %v909_v1  ;;  %vm236_vm15 = vcmp.gt.f32.partialorder %v971_v23, 0.0 }
  0xf8   :  { %v987_v60 = vmul.f32 0.70710677, %v706_v53 }
  0xf9   :  { %161 = vmin.xlane.f32.xlu1 %v160_v15  ;;  %v179_v32 = vadd.f32 %v703_v29, %v178_v28  ;;  %v237_v29 = vmin.f32 %v971_v23, 0.0 }
  0xfa   :  { %v253_v5 = vand.u32 2147483647, %v987_v60  ;;  %vm251_vm6 = vcmp.ge.f32.partialorder %v987_v60, 0.0 }
  0xfb   :  { %v180_v33 = vsel %vm115_vm2, %v179_v32, 0.0  ;;  %v238_v32 = vmul.f32 1.442695, %v237_v29 }
  0xfc   :  { %v254_v9 = vmul.f32 0.3275911, %v253_v5 }
  0xfe   :  { %v255_v10 = vadd.f32 1.0, %v254_v9 }
 0x100   :  { %816 = vrcp.f32 %v255_v10 }
 0x10a   :  { %v817_v12 = vpop.eup %816 }
 0x10b   :  { %v258_v13 = vmul.f32 1.0614054, %v817_v12 }
 0x10d   :  { %v259_v14 = vadd.f32 -1.4531521, %v258_v13 }
 0x10f   :  { %v260_v15 = vmul.f32 %v817_v12, %v259_v14 }
 0x182   :  { %v118_v16 = vpop.xlane.xlu0 %117  ;;  %v151_v40 = vpop.xlane.xlu1 %150 }
 0x183   :  { %v119_v17 = vrot.slane %v118_v16, 4  ;;  %v152_v42 = vrot.slane %v151_v40, 4 }
 0x185   :  { %v120_v18 = vadd.f32 %v119_v17, %v118_v16  ;;  %v153_v44 = vmax.f32 %v151_v40, %v152_v42  ;;  %v218_v16 = vsub.f32 0.0, %v971_v23  ;;  %v280_v17 = vmul.f32 1.2, %v971_v23 }
 0x186   :  { %v162_v41 = vpop.xlane.xlu1 %161 }
 0x187   :  { %v121_v19 = vrot.slane %v120_v18, 2  ;;  %v163_v43 = vrot.slane %v162_v41, 4  ;;  %v154_v46 = vrot.slane %v153_v44, 2 }
 0x189   :  { %v122_v20 = vadd.f32 %v121_v19, %v120_v18  ;;  %v164_v45 = vmin.f32 %v162_v41, %v163_v43  ;;  %v155_v52 = vmax.f32 %v153_v44, %v154_v46  ;;  %v261_v18 = vadd.f32 1.4214138, %v260_v15 }
 0x18a   :  { %v219_v19 = vmul.f32 1.442695, %v218_v16 }
 0x18b   :  { %v123_v21 = vrot.slane %v122_v20, 1  ;;  %v165_v48 = vrot.slane %v164_v45, 2  ;;  %v156_v59 = vrot.slane %v155_v52, 1 }
 0x18c   :  { %818 = vpow2.f32 %v219_v19 }
 0x18d   :  { %v124_v22 = vadd.f32 %v123_v21, %v122_v20  ;;  %v166_v56 = vmin.f32 %v164_v45, %v165_v48  ;;  %v157_v4 = vmax.f32 %v155_v52, %v156_v59  ;;  %v267_v20 = vsub.f32 0.0, %v253_v5 }
 0x18e   :  { %v281_v21 = vsub.f32 0.0, %v280_v17  ;;  %v910_v59 = vmov 0  }
 0x18f   :  { %783 = vpush %v124_v22  ;;  %v167_v63 = vrot.slane %v166_v56, 1  ;;  %v262_v22 = vmul.f32 %v817_v12, %v261_v18 }
 0x190   :  { %v282_v25 = vmul.f32 1.442695, %v281_v21 }
 0x191   :  { %v168_v6 = vmin.f32 %v166_v56, %v167_v63 }
 0x192   :  { %820 = vpow2.f32 %v282_v25 }
 0x1c0   :  { %s784_s0 = spop %783 }
 0x1c1   :  { %v126_v24 = vstv %s784_s0 }
 0x1c2   :  { %v975_v26 = vmul.f32 0.0078125, %v126_v24  ;;  %v268_v24 = vmul.f32 %v267_v20, %v253_v5  ;;  %v292_v20 = vmax.f32 %v971_v23, 0.0 }
 0x1c4   :  { %v128_v27 = vsub.f32 %v962_v11, %v975_v26  ;;  %v269_v28 = vmul.f32 1.442695, %v268_v24  ;;  %vm196_vm5 = vcmp.gt.f32.partialorder %v975_v26, 0.0  ;;  %v205_v56 = vand.u32 2147483647, %v975_v26 }
 0x1c6   :  { %v129_v30 = vmul.f32 %v128_v27, %v128_v27  ;;  %v263_v27 = vadd.f32 -0.28449672, %v262_v22  ;;  %822 = vpow2.f32 %v269_v28 }
 0x1c8   :  { %v130_v31 = vsel %vm115_vm2, %v129_v30, 0.0  ;;  %v264_v30 = vmul.f32 %v817_v12, %v263_v27 }
 0x1c9   :  { %131 = vadd.xlane.f32.xlu0 %v130_v31 }
 0x1ca   :  { %v265_v35 = vadd.f32 0.2548296, %v264_v30 }
 0x1cc   :  { %v266_v39 = vmul.f32 %v817_v12, %v265_v35 }
 0x1cd   :  { %181 = vadd.xlane.f32.xlu0 %v180_v33  ;;  %v819_v33 = vpop.eup %818 }
 0x1ce   :  { %v221_v37 = vadd.f32 1.0, %v819_v33  ;;  %v821_v40 = vpop.eup %820 }
 0x1cf   :  { %v284_v45 = vadd.f32 1.0, %v821_v40 }
 0x1d0   :  { %v823_v42 = vpop.eup %822 }
 0x1d1   :  { %v271_v44 = vmul.f32 %v823_v42, %v266_v39 }
 0x256   :  { %v132_v47 = vpop.xlane.xlu0 %131 }
 0x257   :  { %v133_v49 = vrot.slane %v132_v47, 4 }
 0x259   :  { %v134_v50 = vadd.f32 %v133_v49, %v132_v47  ;;  %v225_v47 = vmul.f32 0.2, %v971_v23 }
 0x25a   :  { %v182_v51 = vpop.xlane.xlu0 %181 }
 0x25b   :  { %v135_v54 = vrot.slane %v134_v50, 2  ;;  %v183_v55 = vrot.slane %v182_v51, 4  ;;  %v226_v30 = vsel %vm224_vm14, %v971_v23, %v225_v47 }
 0x25d   :  { %v184_v57 = vadd.f32 %v183_v55, %v182_v51  ;;  %v136_v58 = vadd.f32 %v135_v54, %v134_v50  ;;  %v272_v55 = vsub.f32 1.0, %v271_v44 }
 0x25f   :  { %v185_v61 = vrot.slane %v184_v57, 2  ;;  %v137_v62 = vrot.slane %v136_v58, 1 }
 0x261   :  { %v138_v2 = vadd.f32 %v137_v62, %v136_v58  ;;  %v186_v3 = vadd.f32 %v185_v61, %v184_v57  ;;  %v197_v61 = vsel %vm196_vm5, 1, %v910_v59 }
 0x263   :  { %785 = vpush %v138_v2  ;;  %v187_v7 = vrot.slane %v186_v3, 1 }
 0x264   :  { %787 = vpush %v157_v4  ;;  %v911_v4 = vmov -1.0  }
 0x265   :  { %789 = vpush %v168_v6  ;;  %v188_v8 = vadd.f32 %v187_v7, %v186_v3  ;;  %v252_v5 = vsel %vm251_vm6, 1.0, %v911_v4 }
 0x266   :  { %v273_v7 = vmul.f32 %v272_v55, %v252_v5 }
 0x267   :  { %791 = vpush %v188_v8  ;;  %v210_v8 = vmul.u32 4, %v197_v61 }
 0x268   :  { %v274_v24 = vadd.f32 1.0, %v273_v7 }
 0x294   :  { %s786_s29 = spop %785 }
 0x295   :  { %v140_v31 = vstv %s786_s29  ;;  %s993_s30 = spop %787 }
 0x296   :  { %v141_v34 = vmul.f32 0.007874016, %v140_v31  ;;  %s995_s4 = spop %789  ;;  %v159_v49 = vstv %s993_s30 }
 0x297   :  { %v170_v50 = vstv %s995_s4 }
 0x298   :  { %824 = vrsqrt.f32 %v141_v34  ;;  %s792_s5 = spop %791  ;;  %vm144_vm7 = vcmp.eq.f32.partialorder %v141_v34, inf  ;;  %v147_v57 = vand.u32 2147483648, %v141_v34  ;;  %vm146_vm8 = vcmp.eq.f32.partialorder %v141_v34, 0.0 }
 0x299   :  { %v190_v36 = vstv %s792_s5  ;;  %826 = vpow2.f32 %v238_v32  ;;  %v200_v63 = vsub.f32 %v159_v49, %v170_v50  ;;  %v249_v32 = vmul.f32 0.5, %v706_v53 }
 0x29a   :  { %v191_v38 = vmul.f32 0.00390625, %v190_v36  ;;  %828 = vlog2.f32 %v221_v37 }
 0x29b   :  { %830 = vtanh.f32 %v971_v23  ;;  %vm201_vm12 = vcmp.gt.f32.partialorder %v200_v63, 1.0 }
 0x29c   :  { %v793_v41 = vtrunc.f32 %v191_v38  ;;  %832 = vrcp.f32 %v221_v37  ;;  %v202_v21 = vsel %vm201_vm12, 1, %v910_v59  ;;  %v275_v37 = vmul.f32 %v274_v24, %v249_v32 }
 0x29d   :  { %834 = vrcp.f32 %v284_v45 }
 0x29e   :  { %v794_v43 = vcvt.f32.s32 %v793_v41 }
 0x2a0   :  { %v193_v46 = vcvt.s32.f32 %v794_v43 }
 0x2a2   :  { %v825_v48 = vpop.eup %824  ;;  %v194_v51 = vmul.f32 256.0, %v193_v46  ;;  %vm208_vm13 = vcmp.gt.f32.partialorder %v193_v46, 64.0 }
 0x2a3   :  { %v827_v52 = vpop.eup %826  ;;  %v143_v54 = vmul.f32 %v825_v48, %v141_v34  ;;  %v209_v22 = vsel %vm208_vm13, 1, %v910_v59 }
 0x2a4   :  { %v195_v58 = vsub.f32 %v190_v36, %v194_v51  ;;  %v705_v3 = vadd.f32 -1.0, %v827_v52  ;;  %v829_v6 = vpop.eup %828  ;;  %v708_v51 = vld [vmem:[%s1107_s2 + $0x1] ss:$0 sm:$0xff] }
 0x2a5   :  { %v145_v62 = vsel %vm144_vm7, %v141_v34, %v143_v54  ;;  %v831_v13 = vpop.eup %830  ;;  %v299_v60 = vmul.f32 0.6931472, %v829_v6 }
 0x2a6   :  { %v148_v2 = vsel %vm146_vm8, %v147_v57, %v145_v62  ;;  %vm203_vm9 = vcmp.lt.f32.partialorder %v195_v58, 64.0  ;;  %v833_v16 = vpop.eup %832  ;;  %v241_v19 = vsel %vm236_vm15, %v971_v23, %v705_v3  ;;  %v305_v25 = vmul.f32 0.5, %v831_v13 }
 0x2a7   :  { %vm198_vm10 = vcmp.gt.f32.partialorder %v148_v2, 0.5  ;;  %v204_v26 = vsel %vm203_vm9, 1, %v910_v59  ;;  %vm206_vm11 = vcmp.lt.f32.partialorder %v205_v56, %v148_v2  ;;  %v835_v27 = vpop.eup %834  ;;  %v242_v31 = vadd.f32 %v241_v19, %v225_v47 }
 0x2a8   :  { %v199_v9 = vsel %vm198_vm10, 1, %v910_v59  ;;  %v207_v10 = vsel %vm206_vm11, 1, %v910_v59  ;;  %v214_v12 = vmul.u32 4, %v204_v26  ;;  %v300_v33 = vadd.f32 %v299_v60, %v292_v20  ;;  %v599_v60 = vld [vmem:[#allocation2 + $0x40] sm:$0xff] }
 0x2a9   :  { %v211_v14 = vmul.u32 2, %v199_v9  ;;  %v215_v15 = vmul.u32 2, %v207_v10  ;;  %v306_v34 = vadd.f32 %v305_v25, %v241_v19  ;;  %v287_v38 = vmul.f32 %v835_v27, %v971_v23  ;;  %v602_v19 = vld [vmem:[#allocation2 + $0x58] sm:$0xff] }
 0x2ab   :  { %v212_v17 = vadd.s32 %v211_v14, %v210_v8  ;;  %v216_v18 = vadd.s32 %v215_v15, %v214_v12 }
 0x2ad   :  { %v213_v28 = vadd.s32 %v212_v17, %v202_v21  ;;  %v217_v29 = vadd.s32 %v216_v18, %v209_v22  ;;  %v601_v17 = vld [vmem:[#allocation2 + $0x50] sm:$0xff] }
 0x2ae   :  { %v781_v20 = vpack.c.bf16 %v602_v19, %v601_v17 }
 0x2af   :  { %vm227_vm0 = vcmp.eq.s32.totalorder %v213_v28, 1  ;;  %vm229_vm3 = vcmp.eq.s32.totalorder %v217_v29, 1  ;;  %vm232_vm4 = vcmp.eq.s32.totalorder %v213_v28, 2  ;;  %vm234_vm5 = vcmp.eq.s32.totalorder %v217_v29, 2 }
 0x2b0   :  { %v228_v35 = vsel %vm227_vm0, %v226_v30, %v833_v16  ;;  %v230_v36 = vsel %vm229_vm3, %v226_v30, %v833_v16  ;;  %vm243_vm6 = vcmp.eq.s32.totalorder %v213_v28, 3  ;;  %vm245_vm7 = vcmp.eq.s32.totalorder %v217_v29, 3  ;;  %v600_v16 = vld [vmem:[#allocation2 + $0x48] sm:$0xff] }
 0x2b1   :  { %v233_v39 = vsel %vm232_vm4, %v831_v13, %v228_v35  ;;  %v235_v40 = vsel %vm234_vm5, %v831_v13, %v230_v36  ;;  %vm276_vm8 = vcmp.eq.s32.totalorder %v213_v28, 4  ;;  %vm278_vm9 = vcmp.eq.s32.totalorder %v217_v29, 4 }
 0x2b2   :  { %v244_v41 = vsel %vm243_vm6, %v242_v31, %v233_v39  ;;  %v246_v42 = vsel %vm245_vm7, %v242_v31, %v235_v40  ;;  %vm288_vm10 = vcmp.eq.s32.totalorder %v213_v28, 5  ;;  %vm290_vm11 = vcmp.eq.s32.totalorder %v217_v29, 5 }
 0x2b3   :  { %v277_v53 = vsel %vm276_vm8, %v275_v37, %v244_v41  ;;  %v279_v43 = vsel %vm278_vm9, %v275_v37, %v246_v42  ;;  %vm301_vm12 = vcmp.eq.s32.totalorder %v213_v28, 6  ;;  %vm303_vm13 = vcmp.eq.s32.totalorder %v217_v29, 6 }
 0x2b4   :  { %v289_v44 = vsel %vm288_vm10, %v287_v38, %v277_v53  ;;  %v291_v45 = vsel %vm290_vm11, %v287_v38, %v279_v43  ;;  %vm307_vm14 = vcmp.eq.s32.totalorder %v213_v28, 7  ;;  %vm309_vm15 = vcmp.eq.s32.totalorder %v217_v29, 7 }
 0x2b5   :  { %v302_v46 = vsel %vm301_vm12, %v300_v33, %v289_v44  ;;  %v304_v47 = vsel %vm303_vm13, %v300_v33, %v291_v45  ;;  %vm311_vm0 = vcmp.ge.f32.partialorder %v962_v11, 0.0  ;;  %v778_v18 = vpack.c.bf16 %v600_v16, %v599_v60 }
 0x2b6   :  { %v308_v23 = vsel %vm307_vm14, %v306_v34, %v302_v46  ;;  %v310_v48 = vsel %vm309_vm15, %v306_v34, %v304_v47 }
 0x2b7   :  { %v312_v49 = vsub.f32 0.0, %v310_v48  ;;  %779 = vmatpush3.bf16.msra.mxu0 %v778_v18 }
 0x2b8   :  { %780 = vmatprep.subr.bf16.mxu0 %v907_v0 }
 0x2b9   :  { %v313_v50 = vsel %vm311_vm0, %v308_v23, %v312_v49 }
 0x2ba   :  { %752 = vmatmul.mubr.msk.f32.vlgmr.msra.gmra.mrb[0].mxu1 %vm41_vm1, %v313_v50 }
 0x2bb   :  { %782 = vmatpush3.bf16.msra.mxu0 %v781_v20 }
 0x38d   :  { %v396_v52 = vpop.f32.mrb[0].mxu1 }
 0x38e   :  { %v1026_v54 = vadd.f32 %v708_v51, %v396_v52  ;;  %v753_v55 = vpop.f32.mrb[1].mxu1 }
 0x390   :  { %v1029_v56 = vand.u32 2147483647, %v1026_v54  ;;  %v400_v57 = vsel %vm115_vm2, %v1026_v54, 0.0  ;;  %vm459_vm3 = vcmp.gt.f32.partialorder %v1026_v54, 0.0  ;;  %v433_v62 = vsel %vm115_vm2, %v1026_v54, -inf }
 0x391   :  { %401 = vadd.xlane.f32.xlu1 %v400_v57  ;;  %v711_v11 = vsel %vm459_vm3, 1.0, %v909_v1  ;;  %v444_v15 = vsel %vm115_vm2, %v1026_v54, inf }
 0x392   :  { %vm456_vm4 = vcmp.lt.f32.partialorder %v1029_v56, 0.01  ;;  %v462_v58 = vmul.f32 256.0, %v711_v11  ;;  %v713_v36 = vclamps-f32 %v1029_v56, 5.0  ;;  %vm520_vm13 = vcmp.gt.f32.partialorder %v1029_v56, 0.0 }
 0x393   :  { %v710_v61 = vsel %vm456_vm4, 1.0, %v909_v1  ;;  %vm508_vm14 = vcmp.ge.f32.partialorder %v1029_v56, 0.0 }
 0x394   :  { %v463_v63 = vadd.f32 %v710_v61, %v462_v58  ;;  %v1051_v42 = vmul.f32 0.70710677, %v713_v36  ;;  %v502_v61 = vsub.f32 0.0, %v1029_v56 }
 0x395   :  { %434 = vmax.xlane.f32.xlu1 %v433_v62  ;;  %v564_v62 = vmul.f32 1.2, %v1029_v56 }
 0x396   :  { %v464_v2 = vsel %vm115_vm2, %v463_v63, 0.0  ;;  %v537_v23 = vand.u32 2147483647, %v1051_v42  ;;  %vm535_vm5 = vcmp.ge.f32.partialorder %v1051_v42, 0.0 }
 0x398   :  { %v538_v51 = vmul.f32 0.3275911, %v537_v23 }
 0x399   :  { %465 = vadd.xlane.f32.xlu1 %v464_v2  ;;  %v551_v2 = vsub.f32 0.0, %v537_v23 }
 0x39a   :  { %v539_v52 = vadd.f32 1.0, %v538_v51 }
 0x39c   :  { %836 = vrcp.f32 %v539_v52 }
 0x3a6   :  { %v837_v55 = vpop.eup %836 }
 0x3a7   :  { %v542_v57 = vmul.f32 1.0614054, %v837_v55 }
 0x3a9   :  { %v543_v11 = vadd.f32 -1.4531521, %v542_v57 }
 0x3ab   :  { %v544_v58 = vmul.f32 %v837_v55, %v543_v11 }
 0x3ad   :  { %v545_v63 = vadd.f32 1.4214138, %v544_v58 }
 0x41e   :  { %v402_v3 = vpop.xlane.xlu1 %401 }
 0x41f   :  { %v403_v5 = vrot.slane %v402_v3, 4 }
 0x421   :  { %v404_v6 = vadd.f32 %v403_v5, %v402_v3  ;;  %v503_v3 = vmul.f32 1.442695, %v502_v61  ;;  %v565_v5 = vsub.f32 0.0, %v564_v62 }
 0x422   :  { %v435_v21 = vpop.xlane.xlu1 %434 }
 0x423   :  { %v405_v26 = vrot.slane %v404_v6, 2  ;;  %v436_v22 = vrot.slane %v435_v21, 4  ;;  %838 = vpow2.f32 %v503_v3 }
 0x425   :  { %v406_v7 = vadd.f32 %v405_v26, %v404_v6  ;;  %v437_v25 = vmax.f32 %v435_v21, %v436_v22  ;;  %v546_v6 = vmul.f32 %v837_v55, %v545_v63  ;;  %v552_v26 = vmul.f32 %v551_v2, %v537_v23 }
 0x426   :  { %v466_v24 = vpop.xlane.xlu1 %465  ;;  %v576_v2 = vmax.f32 %v1029_v56, 0.0 }
 0x427   :  { %v407_v8 = vrot.slane %v406_v7, 1  ;;  %v467_v27 = vrot.slane %v466_v24, 4  ;;  %v438_v28 = vrot.slane %v437_v25, 2 }
 0x429   :  { %v408_v9 = vadd.f32 %v407_v8, %v406_v7  ;;  %v468_v29 = vadd.f32 %v467_v27, %v466_v24  ;;  %v439_v35 = vmax.f32 %v437_v25, %v438_v28  ;;  %v566_v7 = vmul.f32 1.442695, %v565_v5 }
 0x42a   :  { %v547_v8 = vadd.f32 -0.28449672, %v546_v6 }
 0x42b   :  { %795 = vpush %v408_v9  ;;  %v469_v33 = vrot.slane %v468_v29, 2  ;;  %v440_v41 = vrot.slane %v439_v35, 1  ;;  %v553_v9 = vmul.f32 1.442695, %v552_v26  ;;  %840 = vpow2.f32 %v566_v7 }
 0x42d   :  { %v470_v40 = vadd.f32 %v469_v33, %v468_v29  ;;  %v441_v46 = vmax.f32 %v439_v35, %v440_v41  ;;  %842 = vpow2.f32 %v553_v9  ;;  %v839_v60 = vpop.eup %838 }
 0x42e   :  { %v505_v18 = vadd.f32 1.0, %v839_v60 }
 0x42f   :  { %v471_v47 = vrot.slane %v470_v40, 1 }
 0x431   :  { %v472_v50 = vadd.f32 %v471_v47, %v470_v40 }
 0x435   :  { %v841_v19 = vpop.eup %840 }
 0x436   :  { %v568_v25 = vadd.f32 1.0, %v841_v19 }
 0x437   :  { %v843_v24 = vpop.eup %842 }
 0x45c   :  { %s796_s8 = spop %795 }
 0x45d   :  { %v410_v10 = vstv %s796_s8 }
 0x45e   :  { %v1040_v12 = vmul.f32 0.0078125, %v410_v10  ;;  %v521_v10 = vmin.f32 %v1029_v56, 0.0 }
 0x460   :  { %v412_v1 = vsub.f32 %v1026_v54, %v1040_v12 }
 0x462   :  { %v413_v13 = vmul.f32 %v412_v1, %v412_v1  ;;  %v548_v1 = vmul.f32 %v837_v55, %v547_v8 }
 0x464   :  { %v414_v14 = vsel %vm115_vm2, %v413_v13, 0.0  ;;  %v549_v16 = vadd.f32 0.2548296, %v548_v1  ;;  %vm480_vm2 = vcmp.gt.f32.partialorder %v1040_v12, 0.0 }
 0x465   :  { %415 = vadd.xlane.f32.xlu0 %v414_v14 }
 0x466   :  { %v550_v21 = vmul.f32 %v837_v55, %v549_v16 }
 0x468   :  { %v555_v28 = vmul.f32 %v843_v24, %v550_v21 }
 0x469   :  { %445 = vmin.xlane.f32.xlu0 %v444_v15  ;;  %v522_v15 = vmul.f32 1.442695, %v521_v10  ;;  %v533_v10 = vmul.f32 0.5, %v713_v36 }
 0x46a   :  { %v556_v35 = vsub.f32 1.0, %v555_v28 }
 0x4f2   :  { %v416_v30 = vpop.xlane.xlu0 %415 }
 0x4f3   :  { %v417_v31 = vrot.slane %v416_v30, 4 }
 0x4f5   :  { %v418_v32 = vadd.f32 %v417_v31, %v416_v30 }
 0x4f6   :  { %v446_v34 = vpop.xlane.xlu0 %445 }
 0x4f7   :  { %v419_v37 = vrot.slane %v418_v32, 2  ;;  %v447_v38 = vrot.slane %v446_v34, 4 }
 0x4f9   :  { %v448_v39 = vmin.f32 %v446_v34, %v447_v38  ;;  %v420_v0 = vadd.f32 %v419_v37, %v418_v32  ;;  %v489_v32 = vand.u32 2147483647, %v1040_v12  ;;  %v481_v38 = vsel %vm480_vm2, 1, %v910_v59 }
 0x4fb   :  { %v449_v53 = vrot.slane %v448_v39, 2  ;;  %v421_v43 = vrot.slane %v420_v0, 1 }
 0x4fd   :  { %v450_v44 = vmin.f32 %v448_v39, %v449_v53  ;;  %v422_v45 = vadd.f32 %v421_v43, %v420_v0 }
 0x4ff   :  { %797 = vpush %v422_v45  ;;  %v451_v48 = vrot.slane %v450_v44, 1 }
 0x500   :  { %799 = vpush %v441_v46  ;;  %v494_v46 = vmul.u32 4, %v481_v38 }
 0x501   :  { %v452_v49 = vmin.f32 %v450_v44, %v451_v48  ;;  %v536_v44 = vsel %vm535_vm5, 1.0, %v911_v4  ;;  %v509_v4 = vmul.f32 0.2, %v1029_v56 }
 0x502   :  { %v557_v51 = vmul.f32 %v556_v35, %v536_v44 }
 0x503   :  { %801 = vpush %v452_v49  ;;  %v510_v8 = vsel %vm508_vm14, %v1029_v56, %v509_v4  ;;  %vm595_vm14 = vcmp.ge.f32.partialorder %v1026_v54, 0.0 }
 0x504   :  { %803 = vpush %v472_v50  ;;  %v558_v6 = vadd.f32 1.0, %v557_v51 }
 0x506   :  { %v559_v16 = vmul.f32 %v558_v6, %v533_v10 }
 0x530   :  { %s798_s9 = spop %797 }
 0x531   :  { %v424_v13 = vstv %s798_s9  ;;  %s1057_s10 = spop %799 }
 0x532   :  { %v425_v14 = vmul.f32 0.007874016, %v424_v13  ;;  %v443_v39 = vstv %s1057_s10 }
 0x534   :  { %844 = vrsqrt.f32 %v425_v14  ;;  %s1059_s11 = spop %801  ;;  %vm428_vm6 = vcmp.eq.f32.partialorder %v425_v14, inf  ;;  %v431_v0 = vand.u32 2147483648, %v425_v14  ;;  %vm430_vm7 = vcmp.eq.f32.partialorder %v425_v14, 0.0 }
 0x535   :  { %s1061_s12 = spop %803  ;;  %846 = vpow2.f32 %v522_v15  ;;  %v454_v31 = vstv %s1059_s11 }
 0x536   :  { %v474_v17 = vstv %s1061_s12  ;;  %848 = vlog2.f32 %v505_v18  ;;  %v484_v41 = vsub.f32 %v443_v39, %v454_v31 }
 0x537   :  { %v475_v20 = vmul.f32 0.00390625, %v474_v17  ;;  %850 = vtanh.f32 %v1029_v56 }
 0x538   :  { %852 = vrcp.f32 %v505_v18  ;;  %vm485_vm11 = vcmp.gt.f32.partialorder %v484_v41, 1.0 }
 0x539   :  { %v805_v22 = vtrunc.f32 %v475_v20  ;;  %854 = vrcp.f32 %v568_v25  ;;  %v486_v62 = vsel %vm485_vm11, 1, %v910_v59 }
 0x53b   :  { %v806_v27 = vcvt.f32.s32 %v805_v22 }
 0x53d   :  { %v477_v29 = vcvt.s32.f32 %v806_v27 }
 0x53e   :  { %v845_v30 = vpop.eup %844 }
 0x53f   :  { %v427_v33 = vmul.f32 %v845_v30, %v425_v14  ;;  %v478_v34 = vmul.f32 256.0, %v477_v29  ;;  %v847_v37 = vpop.eup %846  ;;  %vm492_vm12 = vcmp.gt.f32.partialorder %v477_v29, 64.0  ;;  %v715_v30 = vld [vmem:[%s1107_s2 + $0x2] ss:$0 sm:$0xff] }
 0x540   :  { %v712_v12 = vadd.f32 -1.0, %v847_v37  ;;  %v849_v45 = vpop.eup %848  ;;  %v493_v5 = vsel %vm492_vm12, 1, %v910_v59 }
 0x541   :  { %v429_v40 = vsel %vm428_vm6, %v425_v14, %v427_v33  ;;  %v479_v53 = vsub.f32 %v474_v17, %v478_v34  ;;  %v851_v52 = vpop.eup %850  ;;  %v583_v58 = vmul.f32 0.6931472, %v849_v45 }
 0x542   :  { %v432_v43 = vsel %vm430_vm7, %v431_v0, %v429_v40  ;;  %v853_v55 = vpop.eup %852  ;;  %v525_v11 = vsel %vm520_vm13, %v1029_v56, %v712_v12  ;;  %v589_v26 = vmul.f32 0.5, %v851_v52 }
 0x543   :  { %vm482_vm8 = vcmp.gt.f32.partialorder %v432_v43, 0.5  ;;  %vm487_vm9 = vcmp.lt.f32.partialorder %v479_v53, 64.0  ;;  %vm490_vm10 = vcmp.lt.f32.partialorder %v489_v32, %v432_v43  ;;  %v855_v61 = vpop.eup %854  ;;  %v526_v9 = vadd.f32 %v525_v11, %v509_v4 }
 0x544   :  { %v483_v47 = vsel %vm482_vm8, 1, %v910_v59  ;;  %v488_v23 = vsel %vm487_vm9, 1, %v910_v59  ;;  %v491_v48 = vsel %vm490_vm10, 1, %v910_v59  ;;  %v584_v1 = vadd.f32 %v583_v58, %v576_v2 }
 0x545   :  { %v495_v49 = vmul.u32 2, %v483_v47  ;;  %v498_v50 = vmul.u32 4, %v488_v23  ;;  %v590_v13 = vadd.f32 %v589_v26, %v525_v11  ;;  %v571_v15 = vmul.f32 %v855_v61, %v1029_v56 }
 0x546   :  { %v499_v42 = vmul.u32 2, %v491_v48 }
 0x547   :  { %v496_v57 = vadd.s32 %v495_v49, %v494_v46 }
 0x548   :  { %v500_v63 = vadd.s32 %v499_v42, %v498_v50 }
 0x549   :  { %v497_v3 = vadd.s32 %v496_v57, %v486_v62 }
 0x54a   :  { %v501_v7 = vadd.s32 %v500_v63, %v493_v5 }
 0x54b   :  { %vm511_vm15 = vcmp.eq.s32.totalorder %v497_v3, 1  ;;  %vm516_vm0 = vcmp.eq.s32.totalorder %v497_v3, 2  ;;  %vm527_vm2 = vcmp.eq.s32.totalorder %v497_v3, 3  ;;  %vm560_vm6 = vcmp.eq.s32.totalorder %v497_v3, 4 }
 0x54c   :  { %v512_v14 = vsel %vm511_vm15, %v510_v8, %v853_v55  ;;  %vm513_vm3 = vcmp.eq.s32.totalorder %v501_v7, 1  ;;  %vm518_vm4 = vcmp.eq.s32.totalorder %v501_v7, 2  ;;  %vm529_vm5 = vcmp.eq.s32.totalorder %v501_v7, 3 }
 0x54d   :  { %v514_v60 = vsel %vm513_vm3, %v510_v8, %v853_v55  ;;  %v517_v59 = vsel %vm516_vm0, %v851_v52, %v512_v14  ;;  %vm562_vm7 = vcmp.eq.s32.totalorder %v501_v7, 4  ;;  %vm572_vm8 = vcmp.eq.s32.totalorder %v497_v3, 5 }
 0x54e   :  { %v519_v17 = vsel %vm518_vm4, %v851_v52, %v514_v60  ;;  %v528_v18 = vsel %vm527_vm2, %v526_v9, %v517_v59  ;;  %vm574_vm9 = vcmp.eq.s32.totalorder %v501_v7, 5  ;;  %vm585_vm10 = vcmp.eq.s32.totalorder %v497_v3, 6 }
 0x54f   :  { %v530_v19 = vsel %vm529_vm5, %v526_v9, %v519_v17  ;;  %v561_v20 = vsel %vm560_vm6, %v559_v16, %v528_v18  ;;  %vm587_vm11 = vcmp.eq.s32.totalorder %v501_v7, 6  ;;  %vm591_vm12 = vcmp.eq.s32.totalorder %v497_v3, 7 }
 0x550   :  { %v563_v36 = vsel %vm562_vm7, %v559_v16, %v530_v19  ;;  %v573_v21 = vsel %vm572_vm8, %v571_v15, %v561_v20  ;;  %vm593_vm13 = vcmp.eq.s32.totalorder %v501_v7, 7  ;;  %vm684_vm15 = vcmask 60416  }
 0x551   :  { %v575_v22 = vsel %vm574_vm9, %v571_v15, %v563_v36  ;;  %v586_v24 = vsel %vm585_vm10, %v584_v1, %v573_v21 }
 0x552   :  { %v588_v56 = vsel %vm587_vm11, %v584_v1, %v575_v22  ;;  %v592_v25 = vsel %vm591_vm12, %v590_v13, %v586_v24 }
 0x553   :  { %v594_v27 = vsel %vm593_vm13, %v590_v13, %v588_v56 }
 0x554   :  { %v596_v28 = vsub.f32 0.0, %v594_v27 }
 0x556   :  { %v597_v29 = vsel %vm595_vm14, %v592_v25, %v596_v28 }
 0x557   :  { %763 = vmatmul.mubr.msk.f32.vlgmr.msra.gmra.mrb[2].mxu0 %vm41_vm1, %v597_v29 }
 0x62a   :  { %v680_v31 = vpop.f32.mrb[2].mxu0 }
 0x62b   :  { %v681_v32 = vadd.f32 %v715_v30, %v680_v31  ;;  %v764_v33 = vpop.f32.mrb[3].mxu0 }
 0x62d   :  { %685 = vst.msk [vmem:[#allocation5] sm:$0xf] %vm684_vm15, %v681_v32 }
 0x62e   :  { %889 = shalt.err (!%p886_p12)
}
 0x62f   :  { %s890_s20 = scalar_lea.hbm %s1108_s3, 64 }
 0x630   :  { %p891_p13 = scmp.ne.s32.totalorder %s1108_s3, %s890_s20  ;;  %p894_p0 = scmp.lt.u32.totalorder %s890_s20, %s1108_s3 }
 0x632   :  { %p896_p1 = pnand %p894_p0, %p891_p13 }
 0x634   :  { %899 = shalt.err (!%p896_p1)
}
 0x635   :  { %695 = dma.vmem_to_hbm [thread:$0]  %s693_s16, 64, %s1108_s3, [#allocation4]  }
 0x636   :  { %902 = dma.done.wait [#allocation4], 64  }
 0x637   :  { %903 = vsyncadd [#allocation4], 4294967232 }
 0x638   :  { %699 = vsyncpa [#allocation3], 1 }
 0x639   :  { %700 = vsyncpa [#allocation4], 1 }

</bundles_post_ra>
